<compile_context>
chip_gen: v7x
topology: tpu7x:2x2x1
jax: 0.10.0
libtpu: 0.0.40
codegen_flags: <defaults>
</compile_context>

<pallas_src>
import jax
import jax.numpy as jnp
import numpy as np
from jax import lax
from jax.experimental import pallas as pl
from jax.experimental.pallas import tpu as pltpu


# --------------------------- fused LSTM + FC kernel ---------------------------
def make_fused_lstm_fc_kernel(num_layers, seq_len, b_pad, hidden):
    """Kernel ref order:
       x2d, (w_ih_t, w_hh_t, bias) * num_layers, fc_w_pad, fc_b_pad,   [inputs]
       out,                                                            [output]
       gates_scr, y_scr                                                [scratch]

    Weight/bias columns for the sigmoid gates (i, f, o) are pre-scaled by 0.5
    in the wrapper, so all four gate nonlinearities reduce to one full-vreg
    tanh followed by a per-lane affine:  act = tanh(gates) * a + b.
    """

    def kernel(*refs):
        x_ref = refs[0]
        idx = 1
        layer_refs = []
        for _ in range(num_layers):
            layer_refs.append((refs[idx], refs[idx + 1], refs[idx + 2]))
            idx += 3
        fcw_ref = refs[idx]
        fcb_ref = refs[idx + 1]
        out_ref = refs[idx + 2]
        gates_scr = refs[idx + 3]   # (S*Bp, 4H) f32 : hoisted input projections
        y_scr = refs[idx + 4]       # (S*Bp, H)  f32 : per-layer hidden outputs

        H = hidden
        Bp = b_pad
        unroll_factor = min(seq_len, 8)

        # Per-lane affine constants for the fused gate nonlinearity (hoisted:
        # JAX does not CSE broadcast_in_dim, so build them once).
        col = lax.broadcasted_iota(jnp.int32, (Bp, 4 * H), 1)
        is_tanh_gate = jnp.logical_and(col >= 2 * H, col < 3 * H)   # the "g" gate
        act_a = jnp.where(is_tanh_gate, 1.0, 0.5).astype(jnp.float32)
        act_b = jnp.where(is_tanh_gate, 0.0, 0.5).astype(jnp.float32)

        for layer, (wih_ref, whh_ref, b_ref) in enumerate(layer_refs):
            # ---- hoisted input projection for ALL timesteps (one big matmul) ----
            inp = x_ref[...] if layer == 0 else y_scr[...]
            gates_scr[...] = (
                jnp.dot(inp, wih_ref[...], preferred_element_type=jnp.float32)
                + b_ref[...]
            )

            # Loop-invariant recurrent weight (tiny at these shapes).
            whh = whh_ref[...]

            # ---- serial recurrence: only h_prev @ W_hh + elementwise per step ----
            def step(t, carry, whh=whh):
                h_prev, c_prev = carry
                start = pl.multiple_of(t * Bp, Bp)
                pre = gates_scr[pl.ds(start, Bp), :]                   # (Bp, 4H)
                gates = pre + jnp.dot(
                    h_prev, whh, preferred_element_type=jnp.float32)
                # sigmoid(x) = 0.5*tanh(x/2)+0.5 ; x/2 already folded into weights.
                act = jnp.tanh(gates) * act_a + act_b
                i_g = act[:, 0 * H:1 * H]
                f_g = act[:, 1 * H:2 * H]
                g_g = act[:, 2 * H:3 * H]
                o_g = act[:, 3 * H:4 * H]
                c_new = f_g * c_prev + i_g * g_g
                h_new = o_g * jnp.tanh(c_new)
                y_scr[pl.ds(start, Bp), :] = h_new
                return (h_new, c_new)

            h0 = jnp.zeros((Bp, H), jnp.float32)
            c0 = jnp.zeros((Bp, H), jnp.float32)
            lax.fori_loop(0, seq_len, step, (h0, c0), unroll=unroll_factor)

        # ---- fused FC epilogue: lane-dense (O padded to 128), single writeback ----
        out_ref[...] = (
            jnp.dot(y_scr[...], fcw_ref[...], preferred_element_type=jnp.float32)
            + fcb_ref[...]
        ).astype(out_ref.dtype)

    return kernel


# ------------------------------- Python wrapper --------------------------------
def lstm_model_forward(x, params):
    """Equivalent of Lstm.forward: x (S, B, input_size) -> (S, B, output_size)."""
    S, B, D = x.shape
    layers = params["lstm_layers"]
    num_layers = len(layers)
    H = layers[0][1].shape[0]
    O = params["fc_w_t"].shape[1]

    Bp = max(8, -(-B // 8) * 8)          # pad batch to full sublanes
    Op = max(128, -(-O // 128) * 128)    # pad FC output to full lanes

    x_pad = jnp.zeros((S, Bp, D), x.dtype).at[:, :B, :].set(x).reshape(S * Bp, D)
    fcw_pad = jnp.zeros((H, Op), jnp.float32).at[:, :O].set(params["fc_w_t"])
    fcb_pad = jnp.zeros((1, Op), jnp.float32).at[:, :O].set(params["fc_b"])

    # Fold the 0.5 pre-scale of sigmoid(x)=0.5*tanh(x/2)+0.5 into the weight /
    # bias columns of the sigmoid gates (i, f, o); tanh gate (g) stays at 1.0.
    # One-time prep outside the kernel -> removes a per-timestep multiply from
    # the serial recurrence path.
    gate_scale = jnp.concatenate([
        jnp.full((2 * H,), 0.5, jnp.float32),   # i, f
        jnp.ones((H,), jnp.float32),            # g
        jnp.full((H,), 0.5, jnp.float32),       # o
    ])

    flat_inputs = [x_pad]
    for (w_ih_t, w_hh_t, bias) in layers:
        flat_inputs += [
            w_ih_t * gate_scale[None, :],
            w_hh_t * gate_scale[None, :],
            bias * gate_scale[None, :],
        ]
    flat_inputs += [fcw_pad, fcb_pad]

    out = pl.pallas_call(
        make_fused_lstm_fc_kernel(num_layers, S, Bp, H),
        out_shape=jax.ShapeDtypeStruct((S * Bp, Op), x.dtype),
        scratch_shapes=[
            pltpu.VMEM((S * Bp, 4 * H), jnp.float32),   # gates_scr
            pltpu.VMEM((S * Bp, H), jnp.float32),       # y_scr
        ],
        compiler_params=pltpu.CompilerParams(
            # Explicit scoped-VMEM limit (v5e default is only 16 MiB); tiny
            # footprint here, but stated explicitly with headroom.
            vmem_limit_bytes=32 * 1024 * 1024,
        ),
    )(*flat_inputs)

    return out.reshape(S, Bp, Op)[:, :B, :O]


def init_params(key, input_size, hidden_size, output_size, num_layers):
    """Deterministic init mimicking PyTorch uniform(-1/sqrt(H), 1/sqrt(H))."""
    k = 1.0 / np.sqrt(hidden_size)
    layers = []
    for layer in range(num_layers):
        in_dim = input_size if layer == 0 else hidden_size
        key, k1, k2, k3, k4 = jax.random.split(key, 5)
        w_ih = jax.random.uniform(k1, (4 * hidden_size, in_dim), jnp.float32, -k, k)
        w_hh = jax.random.uniform(k2, (4 * hidden_size, hidden_size), jnp.float32, -k, k)
        b_ih = jax.random.uniform(k3, (4 * hidden_size,), jnp.float32, -k, k)
        b_hh = jax.random.uniform(k4, (4 * hidden_size,), jnp.float32, -k, k)
        layers.append((w_ih.T, w_hh.T, (b_ih + b_hh).reshape(1, -1)))
    key, k5, k6 = jax.random.split(key, 3)
    kf = 1.0 / np.sqrt(hidden_size)
    fc_w = jax.random.uniform(k5, (output_size, hidden_size), jnp.float32, -kf, kf)
    fc_b = jax.random.uniform(k6, (output_size,), jnp.float32, -kf, kf)
    return {"lstm_layers": layers, "fc_w_t": fc_w.T, "fc_b": fc_b.reshape(1, -1)}


# ------------------------------ Pure-JAX reference -----------------------------
def reference_forward(x, params):
    h = x
    for (w_ih_t, w_hh_t, bias) in params["lstm_layers"]:
        S, B, _ = h.shape
        H = w_hh_t.shape[0]

        def step(carry, x_t):
            h_prev, c_prev = carry
            gates = x_t @ w_ih_t + h_prev @ w_hh_t + bias
            i_g = jax.nn.sigmoid(gates[:, 0 * H:1 * H])
            f_g = jax.nn.sigmoid(gates[:, 1 * H:2 * H])
            g_g = jnp.tanh(gates[:, 2 * H:3 * H])
            o_g = jax.nn.sigmoid(gates[:, 3 * H:4 * H])
            c_new = f_g * c_prev + i_g * g_g
            h_new = o_g * jnp.tanh(c_new)
            return (h_new, c_new), h_new

        init = (jnp.zeros((B, H), jnp.float32), jnp.zeros((B, H), jnp.float32))
        _, ys = jax.lax.scan(step, init, h)
        h = ys
    S, B, H = h.shape
    out = h.reshape(S * B, H) @ params["fc_w_t"] + params["fc_b"]
    return out.reshape(S, B, -1)


if __name__ == "__main__":
    SEQ, BATCH = 8, 2
    INPUT_SIZE, HIDDEN_SIZE, OUTPUT_SIZE, NUM_LAYERS = 16, 32, 10, 2

    key = jax.random.PRNGKey(0)
    key, kx = jax.random.split(key)
    x = jax.random.normal(kx, (SEQ, BATCH, INPUT_SIZE), jnp.float32)
    params = init_params(key, INPUT_SIZE, HIDDEN_SIZE, OUTPUT_SIZE, NUM_LAYERS)

    out = lstm_model_forward(x, params)
    out = jax.block_until_ready(out)

    ref = jax.block_until_ready(reference_forward(x, params))
    assert out.shape == (SEQ, BATCH, OUTPUT_SIZE)
    np.testing.assert_allclose(np.asarray(out), np.asarray(ref), rtol=1e-4, atol=1e-4)

    print("KERNEL_OK")
</pallas_src>

<mosaic_0001>
module attributes {stable_mosaic.version = 11 : i64} {
  func.func @kernel(%arg0: memref<64x16xf32, #tpu.memory_space<vmem>>, %arg1: memref<16x128xf32, #tpu.memory_space<vmem>>, %arg2: memref<32x128xf32, #tpu.memory_space<vmem>>, %arg3: memref<1x128xf32, #tpu.memory_space<vmem>>, %arg4: memref<32x128xf32, #tpu.memory_space<vmem>>, %arg5: memref<32x128xf32, #tpu.memory_space<vmem>>, %arg6: memref<1x128xf32, #tpu.memory_space<vmem>>, %arg7: memref<32x128xf32, #tpu.memory_space<vmem>>, %arg8: memref<1x128xf32, #tpu.memory_space<vmem>>, %arg9: memref<64x128xf32, #tpu.memory_space<vmem>>, %arg10: memref<64x128xf32, #tpu.memory_space<vmem>>, %arg11: memref<64x32xf32, #tpu.memory_space<vmem>>) attributes {dimension_semantics = [], scalar_prefetch = 0 : i64, scratch_operands = 2 : i64, tpu.core_type = #tpu.core_type<tc>} {
    %0 = tpu.iota {dimensions = array<i32: 1>} : vector<8x128xi32>
    %c64_i32 = arith.constant 64 : i32
    %1 = vector.broadcast %c64_i32 : i32 to vector<8x128xi32>
    %2 = arith.cmpi sge, %0, %1 : vector<8x128xi32>
    %c96_i32 = arith.constant 96 : i32
    %3 = vector.broadcast %c96_i32 : i32 to vector<8x128xi32>
    %4 = arith.cmpi slt, %0, %3 : vector<8x128xi32>
    %5 = arith.andi %2, %4 : vector<8x128xi1>
    %cst = arith.constant 1.000000e+00 : f32
    %cst_0 = arith.constant 5.000000e-01 : f32
    %6 = vector.broadcast %cst : f32 to vector<8x128xf32>
    %7 = vector.broadcast %cst_0 : f32 to vector<8x128xf32>
    %8 = arith.select %5, %6, %7 : vector<8x128xi1>, vector<8x128xf32>
    %cst_1 = arith.constant 0.000000e+00 : f32
    %cst_2 = arith.constant 5.000000e-01 : f32
    %9 = vector.broadcast %cst_1 : f32 to vector<8x128xf32>
    %10 = vector.broadcast %cst_2 : f32 to vector<8x128xf32>
    %11 = arith.select %5, %9, %10 : vector<8x128xi1>, vector<8x128xf32>
    %c0 = arith.constant 0 : index
    %c0_3 = arith.constant 0 : index
    %12 = vector.load %arg0[%c0, %c0_3] : memref<64x16xf32, #tpu.memory_space<vmem>>, vector<64x16xf32>
    %c0_4 = arith.constant 0 : index
    %c0_5 = arith.constant 0 : index
    %13 = vector.load %arg1[%c0_4, %c0_5] : memref<16x128xf32, #tpu.memory_space<vmem>>, vector<16x128xf32>
    %cst_6 = arith.constant dense<0.000000e+00> : vector<64x128xf32>
    %14 = tpu.matmul %12, %13, %cst_6 {dimension_numbers = #tpu.dot_dimension_numbers<[1], [0], [0], [1], [0, 0, 1, 1], [], []>} : vector<64x16xf32>, vector<16x128xf32>, vector<64x128xf32> -> vector<64x128xf32>
    %c0_7 = arith.constant 0 : index
    %c0_8 = arith.constant 0 : index
    %15 = vector.load %arg3[%c0_7, %c0_8] : memref<1x128xf32, #tpu.memory_space<vmem>>, vector<1x128xf32>
    %16 = vector.broadcast %15 : vector<1x128xf32> to vector<64x128xf32>
    %17 = arith.addf %14, %16 : vector<64x128xf32>
    %c0_9 = arith.constant 0 : index
    %c0_10 = arith.constant 0 : index
    %18 = vector.load %arg10[%c0_9, %c0_10] : memref<64x128xf32, #tpu.memory_space<vmem>>, vector<64x128xf32>
    tpu.vector_store %arg10[%c0_9, %c0_10], %17 {strides = array<i32>} : memref<64x128xf32, #tpu.memory_space<vmem>>, vector<64x128xf32>,
    %c0_11 = arith.constant 0 : index
    %c0_12 = arith.constant 0 : index
    %19 = vector.load %arg2[%c0_11, %c0_12] : memref<32x128xf32, #tpu.memory_space<vmem>>, vector<32x128xf32>
    %cst_13 = arith.constant 0.000000e+00 : f32
    %20 = vector.broadcast %cst_13 : f32 to vector<8x32xf32>
    %cst_14 = arith.constant 0.000000e+00 : f32
    %21 = vector.broadcast %cst_14 : f32 to vector<8x32xf32>
    %c0_i32 = arith.constant 0 : i32
    %c8_i32 = arith.constant 8 : i32
    %22 = arith.muli %c0_i32, %c8_i32 : i32
    %23 = tpu.assume_multiple %22, 8 : i32
    %24 = arith.index_cast %23 : i32 to index
    %c0_15 = arith.constant 0 : index
    %25 = vector.load %arg10[%24, %c0_15] : memref<64x128xf32, #tpu.memory_space<vmem>>, vector<8x128xf32>
    %cst_16 = arith.constant dense<0.000000e+00> : vector<8x128xf32>
    %26 = tpu.matmul %20, %19, %cst_16 {dimension_numbers = #tpu.dot_dimension_numbers<[1], [0], [0], [1], [0, 0, 1, 1], [], []>} : vector<8x32xf32>, vector<32x128xf32>, vector<8x128xf32> -> vector<8x128xf32>
    %27 = arith.addf %25, %26 : vector<8x128xf32>
    %28 = math.tanh %27 : vector<8x128xf32>
    %29 = arith.mulf %28, %8 : vector<8x128xf32>
    %30 = arith.addf %29, %11 : vector<8x128xf32>
    %31 = vector.extract_strided_slice %30 {offsets = [0, 0], sizes = [8, 32], strides = [1, 1]} : vector<8x128xf32> to vector<8x32xf32>
    %32 = vector.extract_strided_slice %30 {offsets = [0, 32], sizes = [8, 32], strides = [1, 1]} : vector<8x128xf32> to vector<8x32xf32>
    %33 = vector.extract_strided_slice %30 {offsets = [0, 64], sizes = [8, 32], strides = [1, 1]} : vector<8x128xf32> to vector<8x32xf32>
    %34 = vector.extract_strided_slice %30 {offsets = [0, 96], sizes = [8, 32], strides = [1, 1]} : vector<8x128xf32> to vector<8x32xf32>
    %35 = arith.mulf %32, %21 : vector<8x32xf32>
    %36 = arith.mulf %31, %33 : vector<8x32xf32>
    %37 = arith.addf %35, %36 : vector<8x32xf32>
    %38 = math.tanh %37 : vector<8x32xf32>
    %39 = arith.mulf %34, %38 : vector<8x32xf32>
    %40 = arith.index_cast %23 : i32 to index
    %c0_17 = arith.constant 0 : index
    %41 = vector.load %arg11[%40, %c0_17] : memref<64x32xf32, #tpu.memory_space<vmem>>, vector<8x32xf32>
    tpu.vector_store %arg11[%40, %c0_17], %39 {strides = array<i32>} : memref<64x32xf32, #tpu.memory_space<vmem>>, vector<8x32xf32>,
    %c1_i32 = arith.constant 1 : i32
    %c8_i32_18 = arith.constant 8 : i32
    %42 = arith.muli %c1_i32, %c8_i32_18 : i32
    %43 = tpu.assume_multiple %42, 8 : i32
    %44 = arith.index_cast %43 : i32 to index
    %c0_19 = arith.constant 0 : index
    %45 = vector.load %arg10[%44, %c0_19] : memref<64x128xf32, #tpu.memory_space<vmem>>, vector<8x128xf32>
    %cst_20 = arith.constant dense<0.000000e+00> : vector<8x128xf32>
    %46 = tpu.matmul %39, %19, %cst_20 {dimension_numbers = #tpu.dot_dimension_numbers<[1], [0], [0], [1], [0, 0, 1, 1], [], []>} : vector<8x32xf32>, vector<32x128xf32>, vector<8x128xf32> -> vector<8x128xf32>
    %47 = arith.addf %45, %46 : vector<8x128xf32>
    %48 = math.tanh %47 : vector<8x128xf32>
    %49 = arith.mulf %48, %8 : vector<8x128xf32>
    %50 = arith.addf %49, %11 : vector<8x128xf32>
    %51 = vector.extract_strided_slice %50 {offsets = [0, 0], sizes = [8, 32], strides = [1, 1]} : vector<8x128xf32> to vector<8x32xf32>
    %52 = vector.extract_strided_slice %50 {offsets = [0, 32], sizes = [8, 32], strides = [1, 1]} : vector<8x128xf32> to vector<8x32xf32>
    %53 = vector.extract_strided_slice %50 {offsets = [0, 64], sizes = [8, 32], strides = [1, 1]} : vector<8x128xf32> to vector<8x32xf32>
    %54 = vector.extract_strided_slice %50 {offsets = [0, 96], sizes = [8, 32], strides = [1, 1]} : vector<8x128xf32> to vector<8x32xf32>
    %55 = arith.mulf %52, %37 : vector<8x32xf32>
    %56 = arith.mulf %51, %53 : vector<8x32xf32>
    %57 = arith.addf %55, %56 : vector<8x32xf32>
    %58 = math.tanh %57 : vector<8x32xf32>
    %59 = arith.mulf %54, %58 : vector<8x32xf32>
    %60 = arith.index_cast %43 : i32 to index
    %c0_21 = arith.constant 0 : index
    %61 = vector.load %arg11[%60, %c0_21] : memref<64x32xf32, #tpu.memory_space<vmem>>, vector<8x32xf32>
    tpu.vector_store %arg11[%60, %c0_21], %59 {strides = array<i32>} : memref<64x32xf32, #tpu.memory_space<vmem>>, vector<8x32xf32>,
    %c2_i32 = arith.constant 2 : i32
    %c8_i32_22 = arith.constant 8 : i32
    %62 = arith.muli %c2_i32, %c8_i32_22 : i32
    %63 = tpu.assume_multiple %62, 8 : i32
    %64 = arith.index_cast %63 : i32 to index
    %c0_23 = arith.constant 0 : index
    %65 = vector.load %arg10[%64, %c0_23] : memref<64x128xf32, #tpu.memory_space<vmem>>, vector<8x128xf32>
    %cst_24 = arith.constant dense<0.000000e+00> : vector<8x128xf32>
    %66 = tpu.matmul %59, %19, %cst_24 {dimension_numbers = #tpu.dot_dimension_numbers<[1], [0], [0], [1], [0, 0, 1, 1], [], []>} : vector<8x32xf32>, vector<32x128xf32>, vector<8x128xf32> -> vector<8x128xf32>
    %67 = arith.addf %65, %66 : vector<8x128xf32>
    %68 = math.tanh %67 : vector<8x128xf32>
    %69 = arith.mulf %68, %8 : vector<8x128xf32>
    %70 = arith.addf %69, %11 : vector<8x128xf32>
    %71 = vector.extract_strided_slice %70 {offsets = [0, 0], sizes = [8, 32], strides = [1, 1]} : vector<8x128xf32> to vector<8x32xf32>
    %72 = vector.extract_strided_slice %70 {offsets = [0, 32], sizes = [8, 32], strides = [1, 1]} : vector<8x128xf32> to vector<8x32xf32>
    %73 = vector.extract_strided_slice %70 {offsets = [0, 64], sizes = [8, 32], strides = [1, 1]} : vector<8x128xf32> to vector<8x32xf32>
    %74 = vector.extract_strided_slice %70 {offsets = [0, 96], sizes = [8, 32], strides = [1, 1]} : vector<8x128xf32> to vector<8x32xf32>
    %75 = arith.mulf %72, %57 : vector<8x32xf32>
    %76 = arith.mulf %71, %73 : vector<8x32xf32>
    %77 = arith.addf %75, %76 : vector<8x32xf32>
    %78 = math.tanh %77 : vector<8x32xf32>
    %79 = arith.mulf %74, %78 : vector<8x32xf32>
    %80 = arith.index_cast %63 : i32 to index
    %c0_25 = arith.constant 0 : index
    %81 = vector.load %arg11[%80, %c0_25] : memref<64x32xf32, #tpu.memory_space<vmem>>, vector<8x32xf32>
    tpu.vector_store %arg11[%80, %c0_25], %79 {strides = array<i32>} : memref<64x32xf32, #tpu.memory_space<vmem>>, vector<8x32xf32>,
    %c3_i32 = arith.constant 3 : i32
    %c8_i32_26 = arith.constant 8 : i32
    %82 = arith.muli %c3_i32, %c8_i32_26 : i32
    %83 = tpu.assume_multiple %82, 8 : i32
    %84 = arith.index_cast %83 : i32 to index
    %c0_27 = arith.constant 0 : index
    %85 = vector.load %arg10[%84, %c0_27] : memref<64x128xf32, #tpu.memory_space<vmem>>, vector<8x128xf32>
    %cst_28 = arith.constant dense<0.000000e+00> : vector<8x128xf32>
    %86 = tpu.matmul %79, %19, %cst_28 {dimension_numbers = #tpu.dot_dimension_numbers<[1], [0], [0], [1], [0, 0, 1, 1], [], []>} : vector<8x32xf32>, vector<32x128xf32>, vector<8x128xf32> -> vector<8x128xf32>
    %87 = arith.addf %85, %86 : vector<8x128xf32>
    %88 = math.tanh %87 : vector<8x128xf32>
    %89 = arith.mulf %88, %8 : vector<8x128xf32>
    %90 = arith.addf %89, %11 : vector<8x128xf32>
    %91 = vector.extract_strided_slice %90 {offsets = [0, 0], sizes = [8, 32], strides = [1, 1]} : vector<8x128xf32> to vector<8x32xf32>
    %92 = vector.extract_strided_slice %90 {offsets = [0, 32], sizes = [8, 32], strides = [1, 1]} : vector<8x128xf32> to vector<8x32xf32>
    %93 = vector.extract_strided_slice %90 {offsets = [0, 64], sizes = [8, 32], strides = [1, 1]} : vector<8x128xf32> to vector<8x32xf32>
    %94 = vector.extract_strided_slice %90 {offsets = [0, 96], sizes = [8, 32], strides = [1, 1]} : vector<8x128xf32> to vector<8x32xf32>
    %95 = arith.mulf %92, %77 : vector<8x32xf32>
    %96 = arith.mulf %91, %93 : vector<8x32xf32>
    %97 = arith.addf %95, %96 : vector<8x32xf32>
    %98 = math.tanh %97 : vector<8x32xf32>
    %99 = arith.mulf %94, %98 : vector<8x32xf32>
    %100 = arith.index_cast %83 : i32 to index
    %c0_29 = arith.constant 0 : index
    %101 = vector.load %arg11[%100, %c0_29] : memref<64x32xf32, #tpu.memory_space<vmem>>, vector<8x32xf32>
    tpu.vector_store %arg11[%100, %c0_29], %99 {strides = array<i32>} : memref<64x32xf32, #tpu.memory_space<vmem>>, vector<8x32xf32>,
    %c4_i32 = arith.constant 4 : i32
    %c8_i32_30 = arith.constant 8 : i32
    %102 = arith.muli %c4_i32, %c8_i32_30 : i32
    %103 = tpu.assume_multiple %102, 8 : i32
    %104 = arith.index_cast %103 : i32 to index
    %c0_31 = arith.constant 0 : index
    %105 = vector.load %arg10[%104, %c0_31] : memref<64x128xf32, #tpu.memory_space<vmem>>, vector<8x128xf32>
    %cst_32 = arith.constant dense<0.000000e+00> : vector<8x128xf32>
    %106 = tpu.matmul %99, %19, %cst_32 {dimension_numbers = #tpu.dot_dimension_numbers<[1], [0], [0], [1], [0, 0, 1, 1], [], []>} : vector<8x32xf32>, vector<32x128xf32>, vector<8x128xf32> -> vector<8x128xf32>
    %107 = arith.addf %105, %106 : vector<8x128xf32>
    %108 = math.tanh %107 : vector<8x128xf32>
    %109 = arith.mulf %108, %8 : vector<8x128xf32>
    %110 = arith.addf %109, %11 : vector<8x128xf32>
    %111 = vector.extract_strided_slice %110 {offsets = [0, 0], sizes = [8, 32], strides = [1, 1]} : vector<8x128xf32> to vector<8x32xf32>
    %112 = vector.extract_strided_slice %110 {offsets = [0, 32], sizes = [8, 32], strides = [1, 1]} : vector<8x128xf32> to vector<8x32xf32>
    %113 = vector.extract_strided_slice %110 {offsets = [0, 64], sizes = [8, 32], strides = [1, 1]} : vector<8x128xf32> to vector<8x32xf32>
    %114 = vector.extract_strided_slice %110 {offsets = [0, 96], sizes = [8, 32], strides = [1, 1]} : vector<8x128xf32> to vector<8x32xf32>
    %115 = arith.mulf %112, %97 : vector<8x32xf32>
    %116 = arith.mulf %111, %113 : vector<8x32xf32>
    %117 = arith.addf %115, %116 : vector<8x32xf32>
    %118 = math.tanh %117 : vector<8x32xf32>
    %119 = arith.mulf %114, %118 : vector<8x32xf32>
    %120 = arith.index_cast %103 : i32 to index
    %c0_33 = arith.constant 0 : index
    %121 = vector.load %arg11[%120, %c0_33] : memref<64x32xf32, #tpu.memory_space<vmem>>, vector<8x32xf32>
    tpu.vector_store %arg11[%120, %c0_33], %119 {strides = array<i32>} : memref<64x32xf32, #tpu.memory_space<vmem>>, vector<8x32xf32>,
    %c5_i32 = arith.constant 5 : i32
    %c8_i32_34 = arith.constant 8 : i32
    %122 = arith.muli %c5_i32, %c8_i32_34 : i32
    %123 = tpu.assume_multiple %122, 8 : i32
    %124 = arith.index_cast %123 : i32 to index
    %c0_35 = arith.constant 0 : index
    %125 = vector.load %arg10[%124, %c0_35] : memref<64x128xf32, #tpu.memory_space<vmem>>, vector<8x128xf32>
    %cst_36 = arith.constant dense<0.000000e+00> : vector<8x128xf32>
    %126 = tpu.matmul %119, %19, %cst_36 {dimension_numbers = #tpu.dot_dimension_numbers<[1], [0], [0], [1], [0, 0, 1, 1], [], []>} : vector<8x32xf32>, vector<32x128xf32>, vector<8x128xf32> -> vector<8x128xf32>
    %127 = arith.addf %125, %126 : vector<8x128xf32>
    %128 = math.tanh %127 : vector<8x128xf32>
    %129 = arith.mulf %128, %8 : vector<8x128xf32>
    %130 = arith.addf %129, %11 : vector<8x128xf32>
    %131 = vector.extract_strided_slice %130 {offsets = [0, 0], sizes = [8, 32], strides = [1, 1]} : vector<8x128xf32> to vector<8x32xf32>
    %132 = vector.extract_strided_slice %130 {offsets = [0, 32], sizes = [8, 32], strides = [1, 1]} : vector<8x128xf32> to vector<8x32xf32>
    %133 = vector.extract_strided_slice %130 {offsets = [0, 64], sizes = [8, 32], strides = [1, 1]} : vector<8x128xf32> to vector<8x32xf32>
    %134 = vector.extract_strided_slice %130 {offsets = [0, 96], sizes = [8, 32], strides = [1, 1]} : vector<8x128xf32> to vector<8x32xf32>
    %135 = arith.mulf %132, %117 : vector<8x32xf32>
    %136 = arith.mulf %131, %133 : vector<8x32xf32>
    %137 = arith.addf %135, %136 : vector<8x32xf32>
    %138 = math.tanh %137 : vector<8x32xf32>
    %139 = arith.mulf %134, %138 : vector<8x32xf32>
    %140 = arith.index_cast %123 : i32 to index
    %c0_37 = arith.constant 0 : index
    %141 = vector.load %arg11[%140, %c0_37] : memref<64x32xf32, #tpu.memory_space<vmem>>, vector<8x32xf32>
    tpu.vector_store %arg11[%140, %c0_37], %139 {strides = array<i32>} : memref<64x32xf32, #tpu.memory_space<vmem>>, vector<8x32xf32>,
    %c6_i32 = arith.constant 6 : i32
    %c8_i32_38 = arith.constant 8 : i32
    %142 = arith.muli %c6_i32, %c8_i32_38 : i32
    %143 = tpu.assume_multiple %142, 8 : i32
    %144 = arith.index_cast %143 : i32 to index
    %c0_39 = arith.constant 0 : index
    %145 = vector.load %arg10[%144, %c0_39] : memref<64x128xf32, #tpu.memory_space<vmem>>, vector<8x128xf32>
    %cst_40 = arith.constant dense<0.000000e+00> : vector<8x128xf32>
    %146 = tpu.matmul %139, %19, %cst_40 {dimension_numbers = #tpu.dot_dimension_numbers<[1], [0], [0], [1], [0, 0, 1, 1], [], []>} : vector<8x32xf32>, vector<32x128xf32>, vector<8x128xf32> -> vector<8x128xf32>
    %147 = arith.addf %145, %146 : vector<8x128xf32>
    %148 = math.tanh %147 : vector<8x128xf32>
    %149 = arith.mulf %148, %8 : vector<8x128xf32>
    %150 = arith.addf %149, %11 : vector<8x128xf32>
    %151 = vector.extract_strided_slice %150 {offsets = [0, 0], sizes = [8, 32], strides = [1, 1]} : vector<8x128xf32> to vector<8x32xf32>
    %152 = vector.extract_strided_slice %150 {offsets = [0, 32], sizes = [8, 32], strides = [1, 1]} : vector<8x128xf32> to vector<8x32xf32>
    %153 = vector.extract_strided_slice %150 {offsets = [0, 64], sizes = [8, 32], strides = [1, 1]} : vector<8x128xf32> to vector<8x32xf32>
    %154 = vector.extract_strided_slice %150 {offsets = [0, 96], sizes = [8, 32], strides = [1, 1]} : vector<8x128xf32> to vector<8x32xf32>
    %155 = arith.mulf %152, %137 : vector<8x32xf32>
    %156 = arith.mulf %151, %153 : vector<8x32xf32>
    %157 = arith.addf %155, %156 : vector<8x32xf32>
    %158 = math.tanh %157 : vector<8x32xf32>
    %159 = arith.mulf %154, %158 : vector<8x32xf32>
    %160 = arith.index_cast %143 : i32 to index
    %c0_41 = arith.constant 0 : index
    %161 = vector.load %arg11[%160, %c0_41] : memref<64x32xf32, #tpu.memory_space<vmem>>, vector<8x32xf32>
    tpu.vector_store %arg11[%160, %c0_41], %159 {strides = array<i32>} : memref<64x32xf32, #tpu.memory_space<vmem>>, vector<8x32xf32>,
    %c7_i32 = arith.constant 7 : i32
    %c8_i32_42 = arith.constant 8 : i32
    %162 = arith.muli %c7_i32, %c8_i32_42 : i32
    %163 = tpu.assume_multiple %162, 8 : i32
    %164 = arith.index_cast %163 : i32 to index
    %c0_43 = arith.constant 0 : index
    %165 = vector.load %arg10[%164, %c0_43] : memref<64x128xf32, #tpu.memory_space<vmem>>, vector<8x128xf32>
    %cst_44 = arith.constant dense<0.000000e+00> : vector<8x128xf32>
    %166 = tpu.matmul %159, %19, %cst_44 {dimension_numbers = #tpu.dot_dimension_numbers<[1], [0], [0], [1], [0, 0, 1, 1], [], []>} : vector<8x32xf32>, vector<32x128xf32>, vector<8x128xf32> -> vector<8x128xf32>
    %167 = arith.addf %165, %166 : vector<8x128xf32>
    %168 = math.tanh %167 : vector<8x128xf32>
    %169 = arith.mulf %168, %8 : vector<8x128xf32>
    %170 = arith.addf %169, %11 : vector<8x128xf32>
    %171 = vector.extract_strided_slice %170 {offsets = [0, 0], sizes = [8, 32], strides = [1, 1]} : vector<8x128xf32> to vector<8x32xf32>
    %172 = vector.extract_strided_slice %170 {offsets = [0, 32], sizes = [8, 32], strides = [1, 1]} : vector<8x128xf32> to vector<8x32xf32>
    %173 = vector.extract_strided_slice %170 {offsets = [0, 64], sizes = [8, 32], strides = [1, 1]} : vector<8x128xf32> to vector<8x32xf32>
    %174 = vector.extract_strided_slice %170 {offsets = [0, 96], sizes = [8, 32], strides = [1, 1]} : vector<8x128xf32> to vector<8x32xf32>
    %175 = arith.mulf %172, %157 : vector<8x32xf32>
    %176 = arith.mulf %171, %173 : vector<8x32xf32>
    %177 = arith.addf %175, %176 : vector<8x32xf32>
    %178 = math.tanh %177 : vector<8x32xf32>
    %179 = arith.mulf %174, %178 : vector<8x32xf32>
    %180 = arith.index_cast %163 : i32 to index
    %c0_45 = arith.constant 0 : index
    %181 = vector.load %arg11[%180, %c0_45] : memref<64x32xf32, #tpu.memory_space<vmem>>, vector<8x32xf32>
    tpu.vector_store %arg11[%180, %c0_45], %179 {strides = array<i32>} : memref<64x32xf32, #tpu.memory_space<vmem>>, vector<8x32xf32>,
    %c8_i32_46 = arith.constant 8 : i32
    %c0_47 = arith.constant 0 : index
    %c0_48 = arith.constant 0 : index
    %182 = vector.load %arg11[%c0_47, %c0_48] : memref<64x32xf32, #tpu.memory_space<vmem>>, vector<64x32xf32>
    %c0_49 = arith.constant 0 : index
    %c0_50 = arith.constant 0 : index
    %183 = vector.load %arg4[%c0_49, %c0_50] : memref<32x128xf32, #tpu.memory_space<vmem>>, vector<32x128xf32>
    %cst_51 = arith.constant dense<0.000000e+00> : vector<64x128xf32>
    %184 = tpu.matmul %182, %183, %cst_51 {dimension_numbers = #tpu.dot_dimension_numbers<[1], [0], [0], [1], [0, 0, 1, 1], [], []>} : vector<64x32xf32>, vector<32x128xf32>, vector<64x128xf32> -> vector<64x128xf32>
    %c0_52 = arith.constant 0 : index
    %c0_53 = arith.constant 0 : index
    %185 = vector.load %arg6[%c0_52, %c0_53] : memref<1x128xf32, #tpu.memory_space<vmem>>, vector<1x128xf32>
    %186 = vector.broadcast %185 : vector<1x128xf32> to vector<64x128xf32>
    %187 = arith.addf %184, %186 : vector<64x128xf32>
    %c0_54 = arith.constant 0 : index
    %c0_55 = arith.constant 0 : index
    %188 = vector.load %arg10[%c0_54, %c0_55] : memref<64x128xf32, #tpu.memory_space<vmem>>, vector<64x128xf32>
    tpu.vector_store %arg10[%c0_54, %c0_55], %187 {strides = array<i32>} : memref<64x128xf32, #tpu.memory_space<vmem>>, vector<64x128xf32>,
    %c0_56 = arith.constant 0 : index
    %c0_57 = arith.constant 0 : index
    %189 = vector.load %arg5[%c0_56, %c0_57] : memref<32x128xf32, #tpu.memory_space<vmem>>, vector<32x128xf32>
    %cst_58 = arith.constant 0.000000e+00 : f32
    %190 = vector.broadcast %cst_58 : f32 to vector<8x32xf32>
    %cst_59 = arith.constant 0.000000e+00 : f32
    %191 = vector.broadcast %cst_59 : f32 to vector<8x32xf32>
    %c0_i32_60 = arith.constant 0 : i32
    %c8_i32_61 = arith.constant 8 : i32
    %192 = arith.muli %c0_i32_60, %c8_i32_61 : i32
    %193 = tpu.assume_multiple %192, 8 : i32
    %194 = arith.index_cast %193 : i32 to index
    %c0_62 = arith.constant 0 : index
    %195 = vector.load %arg10[%194, %c0_62] : memref<64x128xf32, #tpu.memory_space<vmem>>, vector<8x128xf32>
    %cst_63 = arith.constant dense<0.000000e+00> : vector<8x128xf32>
    %196 = tpu.matmul %190, %189, %cst_63 {dimension_numbers = #tpu.dot_dimension_numbers<[1], [0], [0], [1], [0, 0, 1, 1], [], []>} : vector<8x32xf32>, vector<32x128xf32>, vector<8x128xf32> -> vector<8x128xf32>
    %197 = arith.addf %195, %196 : vector<8x128xf32>
    %198 = math.tanh %197 : vector<8x128xf32>
    %199 = arith.mulf %198, %8 : vector<8x128xf32>
    %200 = arith.addf %199, %11 : vector<8x128xf32>
    %201 = vector.extract_strided_slice %200 {offsets = [0, 0], sizes = [8, 32], strides = [1, 1]} : vector<8x128xf32> to vector<8x32xf32>
    %202 = vector.extract_strided_slice %200 {offsets = [0, 32], sizes = [8, 32], strides = [1, 1]} : vector<8x128xf32> to vector<8x32xf32>
    %203 = vector.extract_strided_slice %200 {offsets = [0, 64], sizes = [8, 32], strides = [1, 1]} : vector<8x128xf32> to vector<8x32xf32>
    %204 = vector.extract_strided_slice %200 {offsets = [0, 96], sizes = [8, 32], strides = [1, 1]} : vector<8x128xf32> to vector<8x32xf32>
    %205 = arith.mulf %202, %191 : vector<8x32xf32>
    %206 = arith.mulf %201, %203 : vector<8x32xf32>
    %207 = arith.addf %205, %206 : vector<8x32xf32>
    %208 = math.tanh %207 : vector<8x32xf32>
    %209 = arith.mulf %204, %208 : vector<8x32xf32>
    %210 = arith.index_cast %193 : i32 to index
    %c0_64 = arith.constant 0 : index
    %211 = vector.load %arg11[%210, %c0_64] : memref<64x32xf32, #tpu.memory_space<vmem>>, vector<8x32xf32>
    tpu.vector_store %arg11[%210, %c0_64], %209 {strides = array<i32>} : memref<64x32xf32, #tpu.memory_space<vmem>>, vector<8x32xf32>,
    %c1_i32_65 = arith.constant 1 : i32
    %c8_i32_66 = arith.constant 8 : i32
    %212 = arith.muli %c1_i32_65, %c8_i32_66 : i32
    %213 = tpu.assume_multiple %212, 8 : i32
    %214 = arith.index_cast %213 : i32 to index
    %c0_67 = arith.constant 0 : index
    %215 = vector.load %arg10[%214, %c0_67] : memref<64x128xf32, #tpu.memory_space<vmem>>, vector<8x128xf32>
    %cst_68 = arith.constant dense<0.000000e+00> : vector<8x128xf32>
    %216 = tpu.matmul %209, %189, %cst_68 {dimension_numbers = #tpu.dot_dimension_numbers<[1], [0], [0], [1], [0, 0, 1, 1], [], []>} : vector<8x32xf32>, vector<32x128xf32>, vector<8x128xf32> -> vector<8x128xf32>
    %217 = arith.addf %215, %216 : vector<8x128xf32>
    %218 = math.tanh %217 : vector<8x128xf32>
    %219 = arith.mulf %218, %8 : vector<8x128xf32>
    %220 = arith.addf %219, %11 : vector<8x128xf32>
    %221 = vector.extract_strided_slice %220 {offsets = [0, 0], sizes = [8, 32], strides = [1, 1]} : vector<8x128xf32> to vector<8x32xf32>
    %222 = vector.extract_strided_slice %220 {offsets = [0, 32], sizes = [8, 32], strides = [1, 1]} : vector<8x128xf32> to vector<8x32xf32>
    %223 = vector.extract_strided_slice %220 {offsets = [0, 64], sizes = [8, 32], strides = [1, 1]} : vector<8x128xf32> to vector<8x32xf32>
    %224 = vector.extract_strided_slice %220 {offsets = [0, 96], sizes = [8, 32], strides = [1, 1]} : vector<8x128xf32> to vector<8x32xf32>
    %225 = arith.mulf %222, %207 : vector<8x32xf32>
    %226 = arith.mulf %221, %223 : vector<8x32xf32>
    %227 = arith.addf %225, %226 : vector<8x32xf32>
    %228 = math.tanh %227 : vector<8x32xf32>
    %229 = arith.mulf %224, %228 : vector<8x32xf32>
    %230 = arith.index_cast %213 : i32 to index
    %c0_69 = arith.constant 0 : index
    %231 = vector.load %arg11[%230, %c0_69] : memref<64x32xf32, #tpu.memory_space<vmem>>, vector<8x32xf32>
    tpu.vector_store %arg11[%230, %c0_69], %229 {strides = array<i32>} : memref<64x32xf32, #tpu.memory_space<vmem>>, vector<8x32xf32>,
    %c2_i32_70 = arith.constant 2 : i32
    %c8_i32_71 = arith.constant 8 : i32
    %232 = arith.muli %c2_i32_70, %c8_i32_71 : i32
    %233 = tpu.assume_multiple %232, 8 : i32
    %234 = arith.index_cast %233 : i32 to index
    %c0_72 = arith.constant 0 : index
    %235 = vector.load %arg10[%234, %c0_72] : memref<64x128xf32, #tpu.memory_space<vmem>>, vector<8x128xf32>
    %cst_73 = arith.constant dense<0.000000e+00> : vector<8x128xf32>
    %236 = tpu.matmul %229, %189, %cst_73 {dimension_numbers = #tpu.dot_dimension_numbers<[1], [0], [0], [1], [0, 0, 1, 1], [], []>} : vector<8x32xf32>, vector<32x128xf32>, vector<8x128xf32> -> vector<8x128xf32>
    %237 = arith.addf %235, %236 : vector<8x128xf32>
    %238 = math.tanh %237 : vector<8x128xf32>
    %239 = arith.mulf %238, %8 : vector<8x128xf32>
    %240 = arith.addf %239, %11 : vector<8x128xf32>
    %241 = vector.extract_strided_slice %240 {offsets = [0, 0], sizes = [8, 32], strides = [1, 1]} : vector<8x128xf32> to vector<8x32xf32>
    %242 = vector.extract_strided_slice %240 {offsets = [0, 32], sizes = [8, 32], strides = [1, 1]} : vector<8x128xf32> to vector<8x32xf32>
    %243 = vector.extract_strided_slice %240 {offsets = [0, 64], sizes = [8, 32], strides = [1, 1]} : vector<8x128xf32> to vector<8x32xf32>
    %244 = vector.extract_strided_slice %240 {offsets = [0, 96], sizes = [8, 32], strides = [1, 1]} : vector<8x128xf32> to vector<8x32xf32>
    %245 = arith.mulf %242, %227 : vector<8x32xf32>
    %246 = arith.mulf %241, %243 : vector<8x32xf32>
    %247 = arith.addf %245, %246 : vector<8x32xf32>
    %248 = math.tanh %247 : vector<8x32xf32>
    %249 = arith.mulf %244, %248 : vector<8x32xf32>
    %250 = arith.index_cast %233 : i32 to index
    %c0_74 = arith.constant 0 : index
    %251 = vector.load %arg11[%250, %c0_74] : memref<64x32xf32, #tpu.memory_space<vmem>>, vector<8x32xf32>
    tpu.vector_store %arg11[%250, %c0_74], %249 {strides = array<i32>} : memref<64x32xf32, #tpu.memory_space<vmem>>, vector<8x32xf32>,
    %c3_i32_75 = arith.constant 3 : i32
    %c8_i32_76 = arith.constant 8 : i32
    %252 = arith.muli %c3_i32_75, %c8_i32_76 : i32
    %253 = tpu.assume_multiple %252, 8 : i32
    %254 = arith.index_cast %253 : i32 to index
    %c0_77 = arith.constant 0 : index
    %255 = vector.load %arg10[%254, %c0_77] : memref<64x128xf32, #tpu.memory_space<vmem>>, vector<8x128xf32>
    %cst_78 = arith.constant dense<0.000000e+00> : vector<8x128xf32>
    %256 = tpu.matmul %249, %189, %cst_78 {dimension_numbers = #tpu.dot_dimension_numbers<[1], [0], [0], [1], [0, 0, 1, 1], [], []>} : vector<8x32xf32>, vector<32x128xf32>, vector<8x128xf32> -> vector<8x128xf32>
    %257 = arith.addf %255, %256 : vector<8x128xf32>
    %258 = math.tanh %257 : vector<8x128xf32>
    %259 = arith.mulf %258, %8 : vector<8x128xf32>
    %260 = arith.addf %259, %11 : vector<8x128xf32>
    %261 = vector.extract_strided_slice %260 {offsets = [0, 0], sizes = [8, 32], strides = [1, 1]} : vector<8x128xf32> to vector<8x32xf32>
    %262 = vector.extract_strided_slice %260 {offsets = [0, 32], sizes = [8, 32], strides = [1, 1]} : vector<8x128xf32> to vector<8x32xf32>
    %263 = vector.extract_strided_slice %260 {offsets = [0, 64], sizes = [8, 32], strides = [1, 1]} : vector<8x128xf32> to vector<8x32xf32>
    %264 = vector.extract_strided_slice %260 {offsets = [0, 96], sizes = [8, 32], strides = [1, 1]} : vector<8x128xf32> to vector<8x32xf32>
    %265 = arith.mulf %262, %247 : vector<8x32xf32>
    %266 = arith.mulf %261, %263 : vector<8x32xf32>
    %267 = arith.addf %265, %266 : vector<8x32xf32>
    %268 = math.tanh %267 : vector<8x32xf32>
    %269 = arith.mulf %264, %268 : vector<8x32xf32>
    %270 = arith.index_cast %253 : i32 to index
    %c0_79 = arith.constant 0 : index
    %271 = vector.load %arg11[%270, %c0_79] : memref<64x32xf32, #tpu.memory_space<vmem>>, vector<8x32xf32>
    tpu.vector_store %arg11[%270, %c0_79], %269 {strides = array<i32>} : memref<64x32xf32, #tpu.memory_space<vmem>>, vector<8x32xf32>,
    %c4_i32_80 = arith.constant 4 : i32
    %c8_i32_81 = arith.constant 8 : i32
    %272 = arith.muli %c4_i32_80, %c8_i32_81 : i32
    %273 = tpu.assume_multiple %272, 8 : i32
    %274 = arith.index_cast %273 : i32 to index
    %c0_82 = arith.constant 0 : index
    %275 = vector.load %arg10[%274, %c0_82] : memref<64x128xf32, #tpu.memory_space<vmem>>, vector<8x128xf32>
    %cst_83 = arith.constant dense<0.000000e+00> : vector<8x128xf32>
    %276 = tpu.matmul %269, %189, %cst_83 {dimension_numbers = #tpu.dot_dimension_numbers<[1], [0], [0], [1], [0, 0, 1, 1], [], []>} : vector<8x32xf32>, vector<32x128xf32>, vector<8x128xf32> -> vector<8x128xf32>
    %277 = arith.addf %275, %276 : vector<8x128xf32>
    %278 = math.tanh %277 : vector<8x128xf32>
    %279 = arith.mulf %278, %8 : vector<8x128xf32>
    %280 = arith.addf %279, %11 : vector<8x128xf32>
    %281 = vector.extract_strided_slice %280 {offsets = [0, 0], sizes = [8, 32], strides = [1, 1]} : vector<8x128xf32> to vector<8x32xf32>
    %282 = vector.extract_strided_slice %280 {offsets = [0, 32], sizes = [8, 32], strides = [1, 1]} : vector<8x128xf32> to vector<8x32xf32>
    %283 = vector.extract_strided_slice %280 {offsets = [0, 64], sizes = [8, 32], strides = [1, 1]} : vector<8x128xf32> to vector<8x32xf32>
    %284 = vector.extract_strided_slice %280 {offsets = [0, 96], sizes = [8, 32], strides = [1, 1]} : vector<8x128xf32> to vector<8x32xf32>
    %285 = arith.mulf %282, %267 : vector<8x32xf32>
    %286 = arith.mulf %281, %283 : vector<8x32xf32>
    %287 = arith.addf %285, %286 : vector<8x32xf32>
    %288 = math.tanh %287 : vector<8x32xf32>
    %289 = arith.mulf %284, %288 : vector<8x32xf32>
    %290 = arith.index_cast %273 : i32 to index
    %c0_84 = arith.constant 0 : index
    %291 = vector.load %arg11[%290, %c0_84] : memref<64x32xf32, #tpu.memory_space<vmem>>, vector<8x32xf32>
    tpu.vector_store %arg11[%290, %c0_84], %289 {strides = array<i32>} : memref<64x32xf32, #tpu.memory_space<vmem>>, vector<8x32xf32>,
    %c5_i32_85 = arith.constant 5 : i32
    %c8_i32_86 = arith.constant 8 : i32
    %292 = arith.muli %c5_i32_85, %c8_i32_86 : i32
    %293 = tpu.assume_multiple %292, 8 : i32
    %294 = arith.index_cast %293 : i32 to index
    %c0_87 = arith.constant 0 : index
    %295 = vector.load %arg10[%294, %c0_87] : memref<64x128xf32, #tpu.memory_space<vmem>>, vector<8x128xf32>
    %cst_88 = arith.constant dense<0.000000e+00> : vector<8x128xf32>
    %296 = tpu.matmul %289, %189, %cst_88 {dimension_numbers = #tpu.dot_dimension_numbers<[1], [0], [0], [1], [0, 0, 1, 1], [], []>} : vector<8x32xf32>, vector<32x128xf32>, vector<8x128xf32> -> vector<8x128xf32>
    %297 = arith.addf %295, %296 : vector<8x128xf32>
    %298 = math.tanh %297 : vector<8x128xf32>
    %299 = arith.mulf %298, %8 : vector<8x128xf32>
    %300 = arith.addf %299, %11 : vector<8x128xf32>
    %301 = vector.extract_strided_slice %300 {offsets = [0, 0], sizes = [8, 32], strides = [1, 1]} : vector<8x128xf32> to vector<8x32xf32>
    %302 = vector.extract_strided_slice %300 {offsets = [0, 32], sizes = [8, 32], strides = [1, 1]} : vector<8x128xf32> to vector<8x32xf32>
    %303 = vector.extract_strided_slice %300 {offsets = [0, 64], sizes = [8, 32], strides = [1, 1]} : vector<8x128xf32> to vector<8x32xf32>
    %304 = vector.extract_strided_slice %300 {offsets = [0, 96], sizes = [8, 32], strides = [1, 1]} : vector<8x128xf32> to vector<8x32xf32>
    %305 = arith.mulf %302, %287 : vector<8x32xf32>
    %306 = arith.mulf %301, %303 : vector<8x32xf32>
    %307 = arith.addf %305, %306 : vector<8x32xf32>
    %308 = math.tanh %307 : vector<8x32xf32>
    %309 = arith.mulf %304, %308 : vector<8x32xf32>
    %310 = arith.index_cast %293 : i32 to index
    %c0_89 = arith.constant 0 : index
    %311 = vector.load %arg11[%310, %c0_89] : memref<64x32xf32, #tpu.memory_space<vmem>>, vector<8x32xf32>
    tpu.vector_store %arg11[%310, %c0_89], %309 {strides = array<i32>} : memref<64x32xf32, #tpu.memory_space<vmem>>, vector<8x32xf32>,
    %c6_i32_90 = arith.constant 6 : i32
    %c8_i32_91 = arith.constant 8 : i32
    %312 = arith.muli %c6_i32_90, %c8_i32_91 : i32
    %313 = tpu.assume_multiple %312, 8 : i32
    %314 = arith.index_cast %313 : i32 to index
    %c0_92 = arith.constant 0 : index
    %315 = vector.load %arg10[%314, %c0_92] : memref<64x128xf32, #tpu.memory_space<vmem>>, vector<8x128xf32>
    %cst_93 = arith.constant dense<0.000000e+00> : vector<8x128xf32>
    %316 = tpu.matmul %309, %189, %cst_93 {dimension_numbers = #tpu.dot_dimension_numbers<[1], [0], [0], [1], [0, 0, 1, 1], [], []>} : vector<8x32xf32>, vector<32x128xf32>, vector<8x128xf32> -> vector<8x128xf32>
    %317 = arith.addf %315, %316 : vector<8x128xf32>
    %318 = math.tanh %317 : vector<8x128xf32>
    %319 = arith.mulf %318, %8 : vector<8x128xf32>
    %320 = arith.addf %319, %11 : vector<8x128xf32>
    %321 = vector.extract_strided_slice %320 {offsets = [0, 0], sizes = [8, 32], strides = [1, 1]} : vector<8x128xf32> to vector<8x32xf32>
    %322 = vector.extract_strided_slice %320 {offsets = [0, 32], sizes = [8, 32], strides = [1, 1]} : vector<8x128xf32> to vector<8x32xf32>
    %323 = vector.extract_strided_slice %320 {offsets = [0, 64], sizes = [8, 32], strides = [1, 1]} : vector<8x128xf32> to vector<8x32xf32>
    %324 = vector.extract_strided_slice %320 {offsets = [0, 96], sizes = [8, 32], strides = [1, 1]} : vector<8x128xf32> to vector<8x32xf32>
    %325 = arith.mulf %322, %307 : vector<8x32xf32>
    %326 = arith.mulf %321, %323 : vector<8x32xf32>
    %327 = arith.addf %325, %326 : vector<8x32xf32>
    %328 = math.tanh %327 : vector<8x32xf32>
    %329 = arith.mulf %324, %328 : vector<8x32xf32>
    %330 = arith.index_cast %313 : i32 to index
    %c0_94 = arith.constant 0 : index
    %331 = vector.load %arg11[%330, %c0_94] : memref<64x32xf32, #tpu.memory_space<vmem>>, vector<8x32xf32>
    tpu.vector_store %arg11[%330, %c0_94], %329 {strides = array<i32>} : memref<64x32xf32, #tpu.memory_space<vmem>>, vector<8x32xf32>,
    %c7_i32_95 = arith.constant 7 : i32
    %c8_i32_96 = arith.constant 8 : i32
    %332 = arith.muli %c7_i32_95, %c8_i32_96 : i32
    %333 = tpu.assume_multiple %332, 8 : i32
    %334 = arith.index_cast %333 : i32 to index
    %c0_97 = arith.constant 0 : index
    %335 = vector.load %arg10[%334, %c0_97] : memref<64x128xf32, #tpu.memory_space<vmem>>, vector<8x128xf32>
    %cst_98 = arith.constant dense<0.000000e+00> : vector<8x128xf32>
    %336 = tpu.matmul %329, %189, %cst_98 {dimension_numbers = #tpu.dot_dimension_numbers<[1], [0], [0], [1], [0, 0, 1, 1], [], []>} : vector<8x32xf32>, vector<32x128xf32>, vector<8x128xf32> -> vector<8x128xf32>
    %337 = arith.addf %335, %336 : vector<8x128xf32>
    %338 = math.tanh %337 : vector<8x128xf32>
    %339 = arith.mulf %338, %8 : vector<8x128xf32>
    %340 = arith.addf %339, %11 : vector<8x128xf32>
    %341 = vector.extract_strided_slice %340 {offsets = [0, 0], sizes = [8, 32], strides = [1, 1]} : vector<8x128xf32> to vector<8x32xf32>
    %342 = vector.extract_strided_slice %340 {offsets = [0, 32], sizes = [8, 32], strides = [1, 1]} : vector<8x128xf32> to vector<8x32xf32>
    %343 = vector.extract_strided_slice %340 {offsets = [0, 64], sizes = [8, 32], strides = [1, 1]} : vector<8x128xf32> to vector<8x32xf32>
    %344 = vector.extract_strided_slice %340 {offsets = [0, 96], sizes = [8, 32], strides = [1, 1]} : vector<8x128xf32> to vector<8x32xf32>
    %345 = arith.mulf %342, %327 : vector<8x32xf32>
    %346 = arith.mulf %341, %343 : vector<8x32xf32>
    %347 = arith.addf %345, %346 : vector<8x32xf32>
    %348 = math.tanh %347 : vector<8x32xf32>
    %349 = arith.mulf %344, %348 : vector<8x32xf32>
    %350 = arith.index_cast %333 : i32 to index
    %c0_99 = arith.constant 0 : index
    %351 = vector.load %arg11[%350, %c0_99] : memref<64x32xf32, #tpu.memory_space<vmem>>, vector<8x32xf32>
    tpu.vector_store %arg11[%350, %c0_99], %349 {strides = array<i32>} : memref<64x32xf32, #tpu.memory_space<vmem>>, vector<8x32xf32>,
    %c8_i32_100 = arith.constant 8 : i32
    %c0_101 = arith.constant 0 : index
    %c0_102 = arith.constant 0 : index
    %352 = vector.load %arg11[%c0_101, %c0_102] : memref<64x32xf32, #tpu.memory_space<vmem>>, vector<64x32xf32>
    %c0_103 = arith.constant 0 : index
    %c0_104 = arith.constant 0 : index
    %353 = vector.load %arg7[%c0_103, %c0_104] : memref<32x128xf32, #tpu.memory_space<vmem>>, vector<32x128xf32>
    %cst_105 = arith.constant dense<0.000000e+00> : vector<64x128xf32>
    %354 = tpu.matmul %352, %353, %cst_105 {dimension_numbers = #tpu.dot_dimension_numbers<[1], [0], [0], [1], [0, 0, 1, 1], [], []>} : vector<64x32xf32>, vector<32x128xf32>, vector<64x128xf32> -> vector<64x128xf32>
    %c0_106 = arith.constant 0 : index
    %c0_107 = arith.constant 0 : index
    %355 = vector.load %arg8[%c0_106, %c0_107] : memref<1x128xf32, #tpu.memory_space<vmem>>, vector<1x128xf32>
    %356 = vector.broadcast %355 : vector<1x128xf32> to vector<64x128xf32>
    %357 = arith.addf %354, %356 : vector<64x128xf32>
    %c0_108 = arith.constant 0 : index
    %c0_109 = arith.constant 0 : index
    %358 = vector.load %arg9[%c0_108, %c0_109] : memref<64x128xf32, #tpu.memory_space<vmem>>, vector<64x128xf32>
    tpu.vector_store %arg9[%c0_108, %c0_109], %357 {strides = array<i32>} : memref<64x128xf32, #tpu.memory_space<vmem>>, vector<64x128xf32>,
    return
  }
}

</mosaic_0001>

<bundles_post_ra>
// kernel: tpu_custom_call.1
= control target key start
LH: loop header
LB: loop body
LE: loop exit
PB: predicated region body
PF: predicated region fallthrough
CT: control target
= control target key end

     0   :  { %14 = vsyncpa [#allocation5], 0  ;;  %s3317_s0 = inlined_call_operand.vmem [shape: f32[64,16], index: 0, kind: input, shape index: {}]   ;;  %s3318_s1 = inlined_call_operand.hbm [shape: f32[16,128], index: 1, kind: input, shape index: {}]   ;;  %s3319_s2 = inlined_call_operand.vmem [shape: f32[32,128], index: 2, kind: input, shape index: {}]   ;;  %s3320_s3 = inlined_call_operand.vmem [shape: f32[1,128], index: 3, kind: input, shape index: {}]   ;;  %s3321_s4 = inlined_call_operand.vmem [shape: f32[32,128], index: 4, kind: input, shape index: {}]   ;;  %s3322_s5 = inlined_call_operand.vmem [shape: f32[32,128], index: 5, kind: input, shape index: {}]   ;;  %s3323_s6 = inlined_call_operand.vmem [shape: f32[1,128], index: 6, kind: input, shape index: {}]   ;;  %s3324_s7 = inlined_call_operand.hbm [shape: f32[32,128], index: 7, kind: input, shape index: {}]   ;;  %s3325_s8 = inlined_call_operand.vmem [shape: f32[1,128], index: 8, kind: input, shape index: {}]   ;;  %s3326_s9 = inlined_call_operand.hbm [shape: f32[64,128], index: 9, kind: output, shape index: {}]  }
   0x1   :  { %15 = vsyncpa [#allocation8], 0 }
   0x2   :  { %16 = vsyncpa [#allocation6], 0  ;;  %s2811_s30 = smov [#allocation4]   ;;  %s2739_s13 = scalar_lea.hbm %s3318_s1, 256 }
   0x3   :  { %s24_s10 = sshll.u32 %s2811_s30, 4  ;;  %p2740_p0 = scmp.ne.s32.totalorder %s3318_s1, %s2739_s13  ;;  %s25_s10 = int_to_ptr.vmem [resolvable:$true] %s24_s10 }
   0x4   :  { %p2743_p1 = scmp.lt.u32.totalorder %s2739_s13, %s3318_s1 }
   0x6   :  { %p2745_p2 = pnand %p2743_p1, %p2740_p0 }
   0x8   :  { %2748 = shalt.err (!%p2745_p2)
}
   0x9   :  { %s2749_s18 = scalar_lea.vmem %s25_s10, 256  ;;  %p2754_p4 = scmp.lt.s32.totalorder %s25_s10, %s25_s10 }
   0xa   :  { %p2750_p3 = scmp.ne.s32.totalorder %s25_s10, %s2749_s18  ;;  %p2755_p5 = scmp.lt.s32.totalorder %s2749_s18, %s2749_s18 }
   0xc   :  { %p2756_p6 = por %p2755_p5, %p2754_p4 }
   0xe   :  { %p2757_p7 = pnand %p2756_p6, %p2750_p3 }
  0x10   :  { %2760 = shalt.err (!%p2757_p7)
}
  0x11   :  { %s2812_s19 = smov 128   ;;  %s2813_s20 = smov 8  }
  0x12   :  { %30 = dma.hbm_to_vmem [thread:$0]  %s3318_s1, 256, %s25_s10, [#allocation5], %s2812_s19, %s2812_s19, %s2813_s20  }
  0x13   :  { %s2814_s23 = smov [#allocation7]   ;;  %s2761_s27 = scalar_lea.hbm %s3324_s7, 512 }
  0x14   :  { %s46_s24 = sshll.u32 %s2814_s23, 4  ;;  %p2762_p8 = scmp.ne.s32.totalorder %s3324_s7, %s2761_s27  ;;  %s47_s24 = int_to_ptr.vmem [resolvable:$true] %s46_s24 }
  0x15   :  { %p2765_p9 = scmp.lt.u32.totalorder %s2761_s27, %s3324_s7 }
  0x17   :  { %p2767_p10 = pnand %p2765_p9, %p2762_p8 }
  0x19   :  { %2770 = shalt.err (!%p2767_p10)
}
  0x1a   :  { %s2771_s12 = scalar_lea.vmem %s47_s24, 512  ;;  %p2776_p12 = scmp.lt.s32.totalorder %s47_s24, %s47_s24 }
  0x1b   :  { %p2772_p11 = scmp.ne.s32.totalorder %s47_s24, %s2771_s12  ;;  %p2777_p13 = scmp.lt.s32.totalorder %s2771_s12, %s2771_s12 }
  0x1d   :  { %p2778_p0 = por %p2777_p13, %p2776_p12 }
  0x1f   :  { %p2779_p1 = pnand %p2778_p0, %p2772_p11 }
  0x21   :  { %2782 = shalt.err (!%p2779_p1)
}
  0x22   :  { %52 = dma.hbm_to_vmem [thread:$0]  %s3324_s7, 512, %s47_s24, [#allocation8], %s2812_s19, %s2812_s19, %s2813_s20  }
  0x23   :  { %2805 = dma.done.wait [#allocation5], 256  }
  0x24   :  { %2806 = vsyncadd [#allocation5], 4294967040 }
  0x25   :  { %2807 = dma.done.wait [#allocation8], 512  }
  0x26   :  { %2808 = vsyncadd [#allocation8], 4294966784  ;;  %vm85_vm0 = vcmask 130048   ;;  %v76_v0 = vld [vmem:[#allocation4] sm:$0xff]  ;;  %v77_v1 = vld [vmem:[#allocation4 + $0x8] sm:$0xff]  ;;  %v2815_v10 = vmov 0.0|0.0   ;;  %v61_v25 = vlaneseq }
  0x27   :  { %v72_v2 = vld [vmem:[%s3317_s0 + $0x20] sm:$0xff]  ;;  %v2546_v3 = vpack.c.bf16 %v77_v1, %v76_v0  ;;  %v224_v5 = vld [vmem:[%s3319_s2 + $0x8] sm:$0xff]  ;;  %v74_v11 = vld [vmem:[%s3317_s0 + $0x30] sm:$0xff]  ;;  %vm2816_vm1 = vmmov 0   ;;  %v2817_v16 = vmov 0.0   ;;  %v2818_v30 = vmov 0.5  }
  0x28   :  { %2324 = vmatprep.mubr.msk.f32.mxu1 %vm85_vm0, %v72_v2  ;;  %v223_v4 = vld [vmem:[%s3319_s2] sm:$0xff]  ;;  %v73_v7 = vld [vmem:[%s3317_s0 + $0x28] sm:$0xff]  ;;  %v225_v12 = vld [vmem:[%s3319_s2 + $0x10] sm:$0xff]  ;;  %v62_v29 = vand.u32 127, %v61_v25  ;;  %s2820_s13 = smov 32   ;;  %vm228_vm5 = vcmask 261120  }
  0x29   :  { %v68_v6 = vld [vmem:[%s3317_s0] sm:$0xff]  ;;  %2662 = vmatprep.subr.bf16.mxu1 %v2546_v3  ;;  %2547 = vmatprep.subr.bf16.mxu0 %v2546_v3  ;;  %v2918_v8 = vpack.c.bf16 %v224_v5, %v223_v4  ;;  %v69_v9 = vld [vmem:[%s3317_s0 + $0x8] sm:$0xff]  ;;  %v226_v13 = vld [vmem:[%s3319_s2 + $0x18] sm:$0xff] }
  0x2a   :  { %2663 = vmatpush3.bf16.msra.mxu1 %v2546_v3  ;;  %2549 = vmatpush3.bf16.msra.mxu0 %v2546_v3  ;;  %v75_v14 = vld [vmem:[%s3317_s0 + $0x38] sm:$0xff]  ;;  %v2942_v15 = vpack.c.bf16 %v226_v13, %v225_v12  ;;  %v2968_v21 = vld [vmem:[%s3320_s3] ss:$0 sm:$0xff]  ;;  %vm63_vm2 = vcmp.ge.s32.totalorder %v62_v29, 64  ;;  %vm64_vm3 = vcmp.lt.s32.totalorder %v62_v29, 96  ;;  %s2819_s3 = smov 64  }
  0x2b   :  { %2550 = vmatprep.subr.bf16.mxu1 %v2815_v10  ;;  %2318 = vmatprep.mubr.msk.f32.mxu0 %vm85_vm0, %v68_v6  ;;  %vm65_vm4 = vmand %vm63_vm2, %vm64_vm3  ;;  %v70_v57 = vld [vmem:[%s3317_s0 + $0x10] sm:$0xff]  ;;  %v71_v58 = vld [vmem:[%s3317_s0 + $0x18] sm:$0xff] }
  0x2c   :  { %2562 = vmatprep.subr.bf16.mxu0 %v2815_v10  ;;  %v2975_v31 = vsel %vm65_vm4, 1.0, %v2818_v30  ;;  %v2977_v33 = vsel %vm65_vm4, 0.0, %v2818_v30 }
  0x2d   :  { %2325 = vmatmul.mubr.msk.f32.vlgmr.msra.gmra.mrb[0].mxu1 %vm85_vm0, %v73_v7  ;;  %2319 = vmatmul.mubr.msk.f32.vlgmr.msra.gmra.mrb[0].mxu0 %vm85_vm0, %v69_v9 }
  0x2e   :  { %2552 = vmatpush3.bf16.msra.mxu1 %v2918_v8  ;;  %2327 = vmatprep.mubr.msk.f32.mxu1 %vm85_vm0, %v74_v11 }
  0x2f   :  { %2553 = vmatprep.subr.bf16.mxu1 %v2815_v10  ;;  %2564 = vmatpush3.bf16.msra.mxu0 %v2918_v8 }
  0x30   :  { %2565 = vmatprep.subr.bf16.mxu0 %v2815_v10  ;;  %2321 = vmatprep.mubr.msk.f32.mxu0 %vm85_vm0, %v70_v57 }
  0x31   :  { %2328 = vmatmul.mubr.msk.f32.gmra.mrb[2].mxu1 %vm85_vm0, %v75_v14  ;;  %2322 = vmatmul.mubr.msk.f32.gmra.mrb[2].mxu0 %vm85_vm0, %v71_v58 }
  0x32   :  { %2555 = vmatpush3.bf16.msra.mxu1 %v2942_v15  ;;  %2338 = vmatprep.mubr.msk.f32.mxu1 %vm2816_vm1, %v2817_v16 }
  0x33   :  { %2556 = vmatprep.subr.bf16.mxu1 %v2815_v10  ;;  %2567 = vmatpush3.bf16.msra.mxu0 %v2942_v15 }
  0x34   :  { %2574 = vmatprep.subr.bf16.mxu0 %v2815_v10  ;;  %2360 = vmatprep.mubr.msk.f32.mxu0 %vm2816_vm1, %v2817_v16 }
  0x35   :  { %2339 = vmatmul.mubr.f32.vlgmr.msra.gmra.mrb[4].mxu1 %v2817_v16 }
  0x36   :  { %2558 = vmatpush3.bf16.msra.mxu1 %v2918_v8  ;;  %2349 = vmatprep.mubr.msk.f32.mxu1 %vm2816_vm1, %v2817_v16 }
  0x37   :  { %2559 = vmatprep.subr.bf16.mxu1 %v2815_v10 }
  0x3a   :  { %2561 = vmatpush3.bf16.msra.mxu1 %v2942_v15 }
  0x3b   :  { %2568 = vmatprep.subr.bf16.mxu1 %v2815_v10 }
 0x100   :  { %v2961_v17 = vpop.f32.mrb[0].mxu1  ;;  %v2320_v18 = vpop.f32.mrb[0].mxu0 }
 0x101   :  { %v2963_v19 = vpop.f32.mrb[1].mxu1  ;;  %v176_v20 = vpop.f32.mrb[1].mxu0  ;;  %v182_v45 = vadd.f32 %v2320_v18, %v2968_v21 }
 0x102   :  { %v177_v24 = vadd.f32 %v2968_v21, %v176_v20 }
 0x104   :  { %v2970_v22 = vpop.f32.mrb[2].mxu1  ;;  %v2323_v62 = vpop.f32.mrb[2].mxu0 }
 0x105   :  { %v2972_v23 = vpop.f32.mrb[3].mxu1  ;;  %v186_v63 = vpop.f32.mrb[3].mxu0 }
 0x106   :  { %v187_v1 = vadd.f32 %v2968_v21, %v186_v63 }
 0x108   :  { %v298_v26 = vpop.f32.mrb[4].mxu1 }
 0x109   :  { %v302_v27 = vadd.f32 %v298_v26, %v177_v24  ;;  %v2340_v28 = vpop.f32.mrb[5].mxu1  ;;  %v192_v26 = vadd.f32 %v2323_v62, %v2968_v21 }
 0x10b   :  { %2675 = vtanh.f32 %v302_v27 }
 0x115   :  { %v2676_v32 = vpop.eup %2675 }
 0x116   :  { %v304_v34 = vmul.f32 %v2676_v32, %v2975_v31 }
 0x118   :  { %v305_v35 = vadd.f32 %v304_v34, %v2977_v33 }
 0x11a   :  { %308 = vrot.lane.b32.xlu0 %v305_v35, %s2819_s3  ;;  %v306_v38 = vmul.f32 0.0, %v305_v35 }
 0x18c   :  { %v309_v36 = vpop.permute.xlu0 %308 }
 0x18d   :  { %v311_v37 = vmul.f32 %v309_v36, %v305_v35 }
 0x18f   :  { %313 = vrot.lane.b32.xlu0 %v311_v37, %s2820_s13 }
 0x201   :  { %v314_v39 = vpop.permute.xlu0 %313 }
 0x202   :  { %v316_v40 = vadd.f32 %v314_v39, %v306_v38 }
 0x204   :  { %2677 = vtanh.f32 %v316_v40 }
 0x20e   :  { %v2678_v41 = vpop.eup %2677 }
 0x20f   :  { %319 = vrot.lane.b32.xlu1 %v2678_v41, %s2819_s3 }
 0x281   :  { %v320_v42 = vpop.permute.xlu1 %319 }
 0x282   :  { %v322_v43 = vmul.f32 %v320_v42, %v305_v35 }
 0x284   :  { %324 = vrot.lane.b32.xlu1 %v322_v43, %s2820_s13 }
 0x2f6   :  { %v325_v44 = vpop.permute.xlu1 %324 }
 0x2f7   :  { %327 = vst.msk [vmem:[#allocation3] sm:$0xff] %vm228_vm5, %v325_v44  ;;  %2350 = vmatmul.mubr.msk.f32.vlgmr.msra.gmra.mrb[6].mxu1 %vm228_vm5, %v325_v44  ;;  %v197_v44 = vadd.f32 %v2968_v21, %v2963_v19 }
 0x2f8   :  { %2570 = vmatpush3.bf16.msra.mxu1 %v2918_v8  ;;  %2371 = vmatprep.mubr.msk.f32.mxu1 %vm2816_vm1, %v2817_v16 }
 0x2f9   :  { %2571 = vmatprep.subr.bf16.mxu1 %v2815_v10 }
 0x2fc   :  { %2573 = vmatpush3.bf16.msra.mxu1 %v2942_v15 }
 0x2fd   :  { %2580 = vmatprep.subr.bf16.mxu1 %v2815_v10 }
 0x3ca   :  { %v398_v46 = vpop.f32.mrb[6].mxu1 }
 0x3cb   :  { %v402_v47 = vadd.f32 %v398_v46, %v182_v45  ;;  %v2351_v48 = vpop.f32.mrb[7].mxu1 }
 0x3cd   :  { %2679 = vtanh.f32 %v402_v47 }
 0x3d7   :  { %v2680_v49 = vpop.eup %2679 }
 0x3d8   :  { %v404_v50 = vmul.f32 %v2680_v49, %v2975_v31 }
 0x3da   :  { %v405_v51 = vadd.f32 %v404_v50, %v2977_v33 }
 0x3dc   :  { %408 = vrot.lane.b32.xlu0 %v405_v51, %s2819_s3  ;;  %v406_v54 = vmul.f32 %v405_v51, %v316_v40 }
 0x44e   :  { %v409_v52 = vpop.permute.xlu0 %408 }
 0x44f   :  { %v411_v53 = vmul.f32 %v409_v52, %v405_v51 }
 0x451   :  { %413 = vrot.lane.b32.xlu1 %v411_v53, %s2820_s13 }
 0x4c3   :  { %v414_v55 = vpop.permute.xlu1 %413 }
 0x4c4   :  { %v416_v56 = vadd.f32 %v414_v55, %v406_v54 }
 0x4c6   :  { %2681 = vtanh.f32 %v416_v56 }
 0x4d0   :  { %v2682_v59 = vpop.eup %2681 }
 0x4d1   :  { %419 = vrot.lane.b32.xlu0 %v2682_v59, %s2819_s3  ;;  %v202_v59 = vadd.f32 %v2961_v17, %v2968_v21  ;;  %v1043_v17 = vld [vmem:[%s3321_s4] sm:$0xff] }
 0x543   :  { %v420_v60 = vpop.permute.xlu0 %419 }
 0x544   :  { %v422_v61 = vmul.f32 %v420_v60, %v405_v51 }
 0x546   :  { %424 = vrot.lane.b32.xlu1 %v422_v61, %s2820_s13 }
 0x5b8   :  { %v425_v0 = vpop.permute.xlu1 %424 }
 0x5b9   :  { %428 = vst.msk [vmem:[#allocation3 + $0x8] sm:$0xff] %vm228_vm5, %v425_v0  ;;  %2361 = vmatmul.mubr.msk.f32.vlgmr.msra.gmra.mrb[4].mxu0 %vm228_vm5, %v425_v0 }
 0x5ba   :  { %2576 = vmatpush3.bf16.msra.mxu0 %v2918_v8  ;;  %2382 = vmatprep.mubr.msk.f32.mxu0 %vm2816_vm1, %v2817_v16 }
 0x5bb   :  { %2577 = vmatprep.subr.bf16.mxu0 %v2815_v10 }
 0x5be   :  { %2579 = vmatpush3.bf16.msra.mxu0 %v2942_v15 }
 0x5bf   :  { %2586 = vmatprep.subr.bf16.mxu0 %v2815_v10 }
 0x68c   :  { %v499_v2 = vpop.f32.mrb[4].mxu0 }
 0x68d   :  { %v503_v3 = vadd.f32 %v499_v2, %v187_v1  ;;  %v2362_v4 = vpop.f32.mrb[5].mxu0 }
 0x68f   :  { %2683 = vtanh.f32 %v503_v3 }
 0x699   :  { %v2684_v5 = vpop.eup %2683 }
 0x69a   :  { %v505_v6 = vmul.f32 %v2684_v5, %v2975_v31  ;;  %v1044_v5 = vld [vmem:[%s3321_s4 + $0x8] sm:$0xff] }
 0x69c   :  { %v506_v7 = vadd.f32 %v505_v6, %v2977_v33  ;;  %v2598_v6 = vpack.c.bf16 %v1044_v5, %v1043_v17 }
 0x69e   :  { %509 = vrot.lane.b32.xlu0 %v506_v7, %s2819_s3  ;;  %v507_v12 = vmul.f32 %v506_v7, %v416_v56 }
 0x710   :  { %v510_v9 = vpop.permute.xlu0 %509 }
 0x711   :  { %v512_v11 = vmul.f32 %v510_v9, %v506_v7 }
 0x713   :  { %514 = vrot.lane.b32.xlu1 %v512_v11, %s2820_s13 }
 0x785   :  { %v515_v13 = vpop.permute.xlu1 %514 }
 0x786   :  { %v517_v14 = vadd.f32 %v515_v13, %v507_v12  ;;  %v1045_v12 = vld [vmem:[%s3321_s4 + $0x10] sm:$0xff]  ;;  %v1046_v13 = vld [vmem:[%s3321_s4 + $0x18] sm:$0xff] }
 0x788   :  { %2685 = vtanh.f32 %v517_v14 }
 0x792   :  { %v2686_v18 = vpop.eup %2685 }
 0x793   :  { %520 = vrot.lane.b32.xlu0 %v2686_v18, %s2819_s3 }
 0x805   :  { %v521_v20 = vpop.permute.xlu0 %520 }
 0x806   :  { %v523_v24 = vmul.f32 %v521_v20, %v506_v7  ;;  %v1035_v20 = vld [vmem:[#allocation3] sm:$0xff] }
 0x808   :  { %525 = vrot.lane.b32.xlu1 %v523_v24, %s2820_s13  ;;  %v1036_v24 = vld [vmem:[#allocation3 + $0x8] sm:$0xff] }
 0x87a   :  { %v526_v25 = vpop.permute.xlu1 %525 }
 0x87b   :  { %529 = vst.msk [vmem:[#allocation3 + $0x10] sm:$0xff] %vm228_vm5, %v526_v25  ;;  %2372 = vmatmul.mubr.msk.f32.vlgmr.msra.gmra.mrb[8].mxu1 %vm228_vm5, %v526_v25 }
 0x87c   :  { %2582 = vmatpush3.bf16.msra.mxu1 %v2918_v8  ;;  %2393 = vmatprep.mubr.msk.f32.mxu1 %vm2816_vm1, %v2817_v16 }
 0x87d   :  { %2583 = vmatprep.subr.bf16.mxu1 %v2815_v10 }
 0x880   :  { %2585 = vmatpush3.bf16.msra.mxu1 %v2942_v15 }
 0x881   :  { %2592 = vmatprep.subr.bf16.mxu1 %v2815_v10 }
 0x882   :  { %v1037_v25 = vld [vmem:[#allocation3 + $0x10] sm:$0xff] }
 0x94e   :  { %v600_v27 = vpop.f32.mrb[8].mxu1 }
 0x94f   :  { %v604_v28 = vadd.f32 %v600_v27, %v192_v26  ;;  %v2373_v29 = vpop.f32.mrb[9].mxu1 }
 0x950   :  { %v207_v29 = vadd.f32 %v2968_v21, %v2972_v23 }
 0x951   :  { %2687 = vtanh.f32 %v604_v28 }
 0x95b   :  { %v2688_v30 = vpop.eup %2687 }
 0x95c   :  { %v606_v32 = vmul.f32 %v2688_v30, %v2975_v31 }
 0x95e   :  { %v607_v34 = vadd.f32 %v606_v32, %v2977_v33 }
 0x960   :  { %610 = vrot.lane.b32.xlu0 %v607_v34, %s2819_s3  ;;  %v608_v37 = vmul.f32 %v607_v34, %v517_v14  ;;  %v2602_v14 = vpack.c.bf16 %v1046_v13, %v1045_v12 }
 0x9d2   :  { %v611_v35 = vpop.permute.xlu0 %610 }
 0x9d3   :  { %v613_v36 = vmul.f32 %v611_v35, %v607_v34 }
 0x9d5   :  { %615 = vrot.lane.b32.xlu1 %v613_v36, %s2820_s13 }
 0xa47   :  { %v616_v38 = vpop.permute.xlu1 %615 }
 0xa48   :  { %v618_v39 = vadd.f32 %v616_v38, %v608_v37 }
 0xa4a   :  { %2689 = vtanh.f32 %v618_v39 }
 0xa54   :  { %v2690_v40 = vpop.eup %2689 }
 0xa55   :  { %621 = vrot.lane.b32.xlu0 %v2690_v40, %s2819_s3 }
 0xac7   :  { %v622_v41 = vpop.permute.xlu0 %621 }
 0xac8   :  { %v624_v42 = vmul.f32 %v622_v41, %v607_v34 }
 0xaca   :  { %626 = vrot.lane.b32.xlu1 %v624_v42, %s2820_s13 }
 0xb3c   :  { %v627_v43 = vpop.permute.xlu1 %626 }
 0xb3d   :  { %630 = vst.msk [vmem:[#allocation3 + $0x18] sm:$0xff] %vm228_vm5, %v627_v43  ;;  %2383 = vmatmul.mubr.msk.f32.vlgmr.msra.gmra.mrb[6].mxu0 %vm228_vm5, %v627_v43 }
 0xb3e   :  { %2588 = vmatpush3.bf16.msra.mxu0 %v2918_v8  ;;  %2404 = vmatprep.mubr.msk.f32.mxu0 %vm2816_vm1, %v2817_v16 }
 0xb3f   :  { %2589 = vmatprep.subr.bf16.mxu0 %v2815_v10 }
 0xb42   :  { %2591 = vmatpush3.bf16.msra.mxu0 %v2942_v15 }
 0xb43   :  { %2599 = vmatprep.subr.bf16.mxu0 %v2598_v6 }
 0xb44   :  { %v1038_v26 = vld [vmem:[#allocation3 + $0x18] sm:$0xff] }
 0xc10   :  { %v701_v45 = vpop.f32.mrb[6].mxu0 }
 0xc11   :  { %v705_v46 = vadd.f32 %v701_v45, %v197_v44  ;;  %v2384_v47 = vpop.f32.mrb[7].mxu0 }
 0xc13   :  { %2691 = vtanh.f32 %v705_v46 }
 0xc1d   :  { %v2692_v48 = vpop.eup %2691 }
 0xc1e   :  { %v707_v49 = vmul.f32 %v2692_v48, %v2975_v31 }
 0xc20   :  { %v708_v50 = vadd.f32 %v707_v49, %v2977_v33  ;;  %v1191_v49 = vld [vmem:[%s3322_s5] sm:$0xff] }
 0xc22   :  { %711 = vrot.lane.b32.xlu0 %v708_v50, %s2819_s3  ;;  %v709_v53 = vmul.f32 %v708_v50, %v618_v39 }
 0xc94   :  { %v712_v51 = vpop.permute.xlu0 %711 }
 0xc95   :  { %v714_v52 = vmul.f32 %v712_v51, %v708_v50 }
 0xc97   :  { %716 = vrot.lane.b32.xlu1 %v714_v52, %s2820_s13  ;;  %v1193_v52 = vld [vmem:[%s3322_s5 + $0x10] sm:$0xff] }
 0xd09   :  { %v717_v54 = vpop.permute.xlu1 %716 }
 0xd0a   :  { %v719_v55 = vadd.f32 %v717_v54, %v709_v53  ;;  %v1194_v53 = vld [vmem:[%s3322_s5 + $0x18] sm:$0xff] }
 0xd0b   :  { %v3128_v54 = vpack.c.bf16 %v1194_v53, %v1193_v52 }
 0xd0c   :  { %2693 = vtanh.f32 %v719_v55 }
 0xd16   :  { %v2694_v19 = vpop.eup %2693 }
 0xd17   :  { %722 = vrot.lane.b32.xlu0 %v2694_v19, %s2819_s3 }
 0xd89   :  { %v723_v56 = vpop.permute.xlu0 %722 }
 0xd8a   :  { %v725_v57 = vmul.f32 %v723_v56, %v708_v50  ;;  %v1192_v50 = vld [vmem:[%s3322_s5 + $0x8] sm:$0xff] }
 0xd8b   :  { %v3118_v51 = vpack.c.bf16 %v1192_v50, %v1191_v49 }
 0xd8c   :  { %727 = vrot.lane.b32.xlu1 %v725_v57, %s2820_s13 }
 0xdfe   :  { %v728_v58 = vpop.permute.xlu1 %727 }
 0xdff   :  { %731 = vst.msk [vmem:[#allocation3 + $0x20] sm:$0xff] %vm228_vm5, %v728_v58  ;;  %2394 = vmatmul.mubr.msk.f32.vlgmr.msra.gmra.mrb[10].mxu1 %vm228_vm5, %v728_v58  ;;  %v212_v58 = vadd.f32 %v2970_v22, %v2968_v21 }
 0xe00   :  { %2594 = vmatpush3.bf16.msra.mxu1 %v2918_v8  ;;  %2415 = vmatprep.mubr.msk.f32.mxu1 %vm2816_vm1, %v2817_v16 }
 0xe01   :  { %2595 = vmatprep.subr.bf16.mxu1 %v2815_v10 }
 0xe04   :  { %2597 = vmatpush3.bf16.msra.mxu1 %v2942_v15 }
 0xe05   :  { %2606 = vmatprep.subr.bf16.mxu1 %v2815_v10 }
 0xe06   :  { %v1039_v27 = vld [vmem:[#allocation3 + $0x20] sm:$0xff] }
 0xed2   :  { %v802_v60 = vpop.f32.mrb[10].mxu1 }
 0xed3   :  { %v806_v61 = vadd.f32 %v802_v60, %v202_v59  ;;  %v2395_v62 = vpop.f32.mrb[11].mxu1 }
 0xed4   :  { %v3154_v62 = vld [vmem:[%s3323_s6] ss:$0 sm:$0xff] }
 0xed5   :  { %2695 = vtanh.f32 %v806_v61 }
 0xedf   :  { %v2696_v63 = vpop.eup %2695 }
 0xee0   :  { %v808_v0 = vmul.f32 %v2696_v63, %v2975_v31 }
 0xee2   :  { %v809_v8 = vadd.f32 %v808_v0, %v2977_v33 }
 0xee4   :  { %812 = vrot.lane.b32.xlu0 %v809_v8, %s2819_s3  ;;  %v810_v15 = vmul.f32 %v809_v8, %v719_v55 }
 0xf56   :  { %v813_v1 = vpop.permute.xlu0 %812 }
 0xf57   :  { %v815_v2 = vmul.f32 %v813_v1, %v809_v8 }
 0xf59   :  { %817 = vrot.lane.b32.xlu1 %v815_v2, %s2820_s13 }
 0xfcb   :  { %v818_v3 = vpop.permute.xlu1 %817 }
 0xfcc   :  { %v820_v4 = vadd.f32 %v818_v3, %v810_v15 }
 0xfce   :  { %2697 = vtanh.f32 %v820_v4 }
 0xfd8   :  { %v2698_v7 = vpop.eup %2697 }
 0xfd9   :  { %823 = vrot.lane.b32.xlu0 %v2698_v7, %s2819_s3 }
0x104b   :  { %v824_v9 = vpop.permute.xlu0 %823 }
0x104c   :  { %v826_v11 = vmul.f32 %v824_v9, %v809_v8 }
0x104e   :  { %828 = vrot.lane.b32.xlu1 %v826_v11, %s2820_s13 }
0x10c0   :  { %v829_v18 = vpop.permute.xlu1 %828 }
0x10c1   :  { %832 = vst.msk [vmem:[#allocation3 + $0x28] sm:$0xff] %vm228_vm5, %v829_v18  ;;  %2405 = vmatmul.mubr.msk.f32.vlgmr.msra.gmra.mrb[8].mxu0 %vm228_vm5, %v829_v18 }
0x10c2   :  { %2601 = vmatpush3.bf16.msra.mxu0 %v2598_v6  ;;  %2426 = vmatprep.mubr.msk.f32.mxu0 %vm228_vm5, %v1035_v20 }
0x10c3   :  { %2603 = vmatprep.subr.bf16.mxu0 %v2602_v14 }
0x10c6   :  { %2605 = vmatpush3.bf16.msra.mxu0 %v2602_v14 }
0x10c7   :  { %2618 = vmatprep.subr.bf16.mxu0 %v2815_v10 }
0x10c8   :  { %v1040_v28 = vld [vmem:[#allocation3 + $0x28] sm:$0xff] }
0x10c9   :  { %2427 = vmatmul.mubr.msk.f32.vlgmr.msra.gmra.mrb[10].mxu0 %vm228_vm5, %v1036_v24 }
0x10ca   :  { %2429 = vmatprep.mubr.msk.f32.mxu0 %vm228_vm5, %v1037_v25  ;;  %2620 = vmatpush3.bf16.msra.mxu0 %v3118_v51 }
0x10cb   :  { %2621 = vmatprep.subr.bf16.mxu0 %v2815_v10 }
0x10cd   :  { %2430 = vmatmul.mubr.msk.f32.gmra.mrb[12].mxu0 %vm228_vm5, %v1038_v26 }
0x10ce   :  { %2432 = vmatprep.mubr.msk.f32.mxu0 %vm228_vm5, %v1039_v27  ;;  %2623 = vmatpush3.bf16.msra.mxu0 %v3128_v54 }
0x10cf   :  { %2630 = vmatprep.subr.bf16.mxu0 %v2815_v10 }
0x10d1   :  { %2433 = vmatmul.mubr.msk.f32.gmra.mrb[14].mxu0 %vm228_vm5, %v1040_v28 }
0x1194   :  { %v903_v30 = vpop.f32.mrb[8].mxu0 }
0x1195   :  { %v907_v32 = vadd.f32 %v903_v30, %v207_v29  ;;  %v2406_v34 = vpop.f32.mrb[9].mxu0 }
0x1197   :  { %2699 = vtanh.f32 %v907_v32 }
0x119c   :  { %v3094_v35 = vpop.f32.mrb[10].mxu0 }
0x119d   :  { %v1144_v36 = vpop.f32.mrb[11].mxu0  ;;  %v1150_v30 = vadd.f32 %v3094_v35, %v3154_v62 }
0x119e   :  { %v1145_v63 = vadd.f32 %v3154_v62, %v1144_v36 }
0x11a0   :  { %v3096_v37 = vpop.f32.mrb[12].mxu0 }
0x11a1   :  { %v2700_v38 = vpop.eup %2699  ;;  %v3098_v39 = vpop.f32.mrb[13].mxu0 }
0x11a2   :  { %v909_v40 = vmul.f32 %v2700_v38, %v2975_v31 }
0x11a4   :  { %v3101_v41 = vpop.f32.mrb[14].mxu0  ;;  %v910_v42 = vadd.f32 %v909_v40, %v2977_v33 }
0x11a5   :  { %v3104_v43 = vpop.f32.mrb[15].mxu0 }
0x11a6   :  { %913 = vrot.lane.b32.xlu0 %v910_v42, %s2819_s3  ;;  %v911_v45 = vmul.f32 %v910_v42, %v820_v4 }
0x1218   :  { %v914_v23 = vpop.permute.xlu0 %913 }
0x1219   :  { %v916_v44 = vmul.f32 %v914_v23, %v910_v42 }
0x121b   :  { %918 = vrot.lane.b32.xlu1 %v916_v44, %s2820_s13 }
0x128d   :  { %v919_v46 = vpop.permute.xlu1 %918 }
0x128e   :  { %v3108_v47 = vadd.f32 %v919_v46, %v911_v45 }
0x1290   :  { %2701 = vtanh.f32 %v3108_v47 }
0x129a   :  { %v2702_v48 = vpop.eup %2701 }
0x129b   :  { %924 = vrot.lane.b32.xlu0 %v2702_v48, %s2819_s3 }
0x130d   :  { %v925_v55 = vpop.permute.xlu0 %924 }
0x130e   :  { %v927_v19 = vmul.f32 %v925_v55, %v910_v42 }
0x1310   :  { %929 = vrot.lane.b32.xlu1 %v927_v19, %s2820_s13 }
0x1382   :  { %v930_v56 = vpop.permute.xlu1 %929 }
0x1383   :  { %933 = vst.msk [vmem:[#allocation3 + $0x30] sm:$0xff] %vm228_vm5, %v930_v56  ;;  %2416 = vmatmul.mubr.msk.f32.vlgmr.msra.gmra.mrb[12].mxu1 %vm228_vm5, %v930_v56  ;;  %v1155_v56 = vadd.f32 %v3154_v62, %v3098_v39 }
0x1384   :  { %2608 = vmatpush3.bf16.msra.mxu1 %v3118_v51  ;;  %2446 = vmatprep.mubr.msk.f32.mxu1 %vm2816_vm1, %v2817_v16 }
0x1385   :  { %2609 = vmatprep.subr.bf16.mxu1 %v2815_v10 }
0x1388   :  { %2611 = vmatpush3.bf16.msra.mxu1 %v3128_v54 }
0x1389   :  { %2612 = vmatprep.subr.bf16.mxu1 %v2815_v10 }
0x138a   :  { %v1041_v57 = vld [vmem:[#allocation3 + $0x30] sm:$0xff] }
0x138b   :  { %2447 = vmatmul.mubr.f32.vlgmr.msra.gmra.mrb[14].mxu1 %v2817_v16  ;;  %2435 = vmatprep.mubr.msk.f32.mxu0 %vm228_vm5, %v1041_v57 }
0x138c   :  { %2614 = vmatpush3.bf16.msra.mxu1 %v3118_v51  ;;  %2457 = vmatprep.mubr.msk.f32.mxu1 %vm2816_vm1, %v2817_v16 }
0x138d   :  { %2615 = vmatprep.subr.bf16.mxu1 %v2815_v10 }
0x1390   :  { %2617 = vmatpush3.bf16.msra.mxu1 %v3128_v54 }
0x1391   :  { %2624 = vmatprep.subr.bf16.mxu1 %v2815_v10 }
0x1456   :  { %v1004_v59 = vpop.f32.mrb[12].mxu1 }
0x1457   :  { %v1008_v60 = vadd.f32 %v1004_v59, %v212_v58  ;;  %v2417_v61 = vpop.f32.mrb[13].mxu1 }
0x145e   :  { %v1262_v0 = vpop.f32.mrb[14].mxu1 }
0x145f   :  { %v1266_v8 = vadd.f32 %v1262_v0, %v1145_v63  ;;  %v2448_v1 = vpop.f32.mrb[15].mxu1 }
0x1461   :  { %2703 = vtanh.f32 %v1266_v8 }
0x1462   :  { %2705 = vtanh.f32 %v1008_v60 }
0x146b   :  { %v2704_v2 = vpop.eup %2703 }
0x146c   :  { %v1268_v15 = vmul.f32 %v2704_v2, %v2975_v31  ;;  %v2706_v6 = vpop.eup %2705 }
0x146d   :  { %v1010_v7 = vmul.f32 %v2706_v6, %v2975_v31 }
0x146e   :  { %v1269_v3 = vadd.f32 %v1268_v15, %v2977_v33 }
0x146f   :  { %v1011_v11 = vadd.f32 %v1010_v7, %v2977_v33 }
0x1470   :  { %1272 = vrot.lane.b32.xlu0 %v1269_v3, %s2819_s3  ;;  %v1270_v4 = vmul.f32 0.0, %v1269_v3 }
0x1471   :  { %v1012_v24 = vmul.f32 %v1011_v11, %v3108_v47 }
0x14e2   :  { %v1273_v21 = vpop.permute.xlu0 %1272 }
0x14e3   :  { %v1275_v22 = vmul.f32 %v1273_v21, %v1269_v3 }
0x14e5   :  { %1277 = vrot.lane.b32.xlu1 %v1275_v22, %s2820_s13 }
0x1557   :  { %v1278_v17 = vpop.permute.xlu1 %1277 }
0x1558   :  { %v1280_v5 = vadd.f32 %v1278_v17, %v1270_v4  ;;  %v1160_v4 = vadd.f32 %v3096_v37, %v3154_v62 }
0x155a   :  { %2707 = vtanh.f32 %v1280_v5 }
0x1564   :  { %v2708_v9 = vpop.eup %2707 }
0x1565   :  { %1283 = vrot.lane.b32.xlu0 %v2708_v9, %s2819_s3 }
0x1569   :  { %1014 = vrot.lane.b32.xlu0 %v1011_v11, %s2819_s3 }
0x15d7   :  { %v1284_v12 = vpop.permute.xlu0 %1283 }
0x15d8   :  { %v1286_v13 = vmul.f32 %v1284_v12, %v1269_v3 }
0x15da   :  { %1288 = vrot.lane.b32.xlu1 %v1286_v13, %s2820_s13 }
0x15db   :  { %v1015_v14 = vpop.permute.xlu0 %1014 }
0x15dc   :  { %v1017_v18 = vmul.f32 %v1015_v14, %v1011_v11 }
0x15de   :  { %1019 = vrot.lane.b32.xlu0 %v1017_v18, %s2820_s13 }
0x164c   :  { %v1289_v20 = vpop.permute.xlu1 %1288 }
0x164d   :  { %1291 = vst.msk [vmem:[#allocation3] sm:$0xff] %vm228_vm5, %v1289_v20  ;;  %2458 = vmatmul.mubr.msk.f32.vlgmr.msra.gmra.mrb[16].mxu1 %vm228_vm5, %v1289_v20 }
0x164e   :  { %2626 = vmatpush3.bf16.msra.mxu1 %v3118_v51  ;;  %2479 = vmatprep.mubr.msk.f32.mxu1 %vm2816_vm1, %v2817_v16 }
0x164f   :  { %2627 = vmatprep.subr.bf16.mxu1 %v2815_v10 }
0x1650   :  { %v1020_v25 = vpop.permute.xlu0 %1019 }
0x1651   :  { %v1022_v26 = vadd.f32 %v1020_v25, %v1012_v24 }
0x1652   :  { %2629 = vmatpush3.bf16.msra.mxu1 %v3128_v54 }
0x1653   :  { %2709 = vtanh.f32 %v1022_v26  ;;  %2636 = vmatprep.subr.bf16.mxu1 %v2815_v10 }
0x165d   :  { %v2710_v27 = vpop.eup %2709 }
0x165e   :  { %1025 = vrot.lane.b32.xlu0 %v2710_v27, %s2819_s3  ;;  %v1165_v27 = vadd.f32 %v3154_v62, %v3104_v43 }
0x16d0   :  { %v1026_v28 = vpop.permute.xlu0 %1025 }
0x16d1   :  { %v1028_v29 = vmul.f32 %v1026_v28, %v1011_v11 }
0x16d3   :  { %1030 = vrot.lane.b32.xlu0 %v1028_v29, %s2820_s13 }
0x1720   :  { %v1361_v32 = vpop.f32.mrb[16].mxu1 }
0x1721   :  { %v1365_v34 = vadd.f32 %v1361_v32, %v1150_v30  ;;  %v2459_v36 = vpop.f32.mrb[17].mxu1 }
0x1723   :  { %2711 = vtanh.f32 %v1365_v34 }
0x172d   :  { %v2712_v38 = vpop.eup %2711 }
0x172e   :  { %v1367_v40 = vmul.f32 %v2712_v38, %v2975_v31 }
0x1730   :  { %v1368_v42 = vadd.f32 %v1367_v40, %v2977_v33 }
0x1732   :  { %1371 = vrot.lane.b32.xlu1 %v1368_v42, %s2819_s3  ;;  %v1369_v46 = vmul.f32 %v1368_v42, %v1280_v5 }
0x1745   :  { %v1031_v23 = vpop.permute.xlu0 %1030 }
0x1746   :  { %1034 = vst.msk [vmem:[#allocation3 + $0x38] sm:$0xff] %vm228_vm5, %v1031_v23 }
0x174d   :  { %v1042_v44 = vld [vmem:[#allocation3 + $0x38] sm:$0xff] }
0x174e   :  { %2436 = vmatmul.mubr.msk.f32.gmra.mrb[16].mxu0 %vm228_vm5, %v1042_v44 }
0x174f   :  { %2468 = vmatprep.mubr.msk.f32.mxu0 %vm2816_vm1, %v2817_v16 }
0x17a4   :  { %v1372_v35 = vpop.permute.xlu1 %1371 }
0x17a5   :  { %v1374_v45 = vmul.f32 %v1372_v35, %v1368_v42 }
0x17a7   :  { %1376 = vrot.lane.b32.xlu1 %v1374_v45, %s2820_s13 }
0x1819   :  { %v1377_v47 = vpop.permute.xlu1 %1376 }
0x181a   :  { %v1379_v48 = vadd.f32 %v1377_v47, %v1369_v46  ;;  %v1170_v47 = vadd.f32 %v3101_v41, %v3154_v62  ;;  %v1993_v41 = vld [vmem:[#allocation7] sm:$0xff] }
0x181c   :  { %2713 = vtanh.f32 %v1379_v48 }
0x1821   :  { %v3188_v49 = vpop.f32.mrb[16].mxu0 }
0x1822   :  { %v3190_v50 = vpop.f32.mrb[17].mxu0 }
0x1826   :  { %v2714_v52 = vpop.eup %2713 }
0x1827   :  { %1382 = vrot.lane.b32.xlu1 %v2714_v52, %s2819_s3 }
0x1899   :  { %v1383_v53 = vpop.permute.xlu1 %1382 }
0x189a   :  { %v1385_v55 = vmul.f32 %v1383_v53, %v1368_v42 }
0x189c   :  { %1387 = vrot.lane.b32.xlu1 %v1385_v55, %s2820_s13 }
0x190e   :  { %v1388_v19 = vpop.permute.xlu1 %1387 }
0x190f   :  { %1390 = vst.msk [vmem:[#allocation3 + $0x8] sm:$0xff] %vm228_vm5, %v1388_v19  ;;  %2469 = vmatmul.mubr.msk.f32.vlgmr.msra.gmra.mrb[18].mxu0 %vm228_vm5, %v1388_v19 }
0x1910   :  { %2632 = vmatpush3.bf16.msra.mxu0 %v3118_v51  ;;  %2490 = vmatprep.mubr.msk.f32.mxu0 %vm2816_vm1, %v2817_v16 }
0x1911   :  { %2633 = vmatprep.subr.bf16.mxu0 %v2815_v10 }
0x1914   :  { %2635 = vmatpush3.bf16.msra.mxu0 %v3128_v54 }
0x1915   :  { %2642 = vmatprep.subr.bf16.mxu0 %v2815_v10 }
0x19e2   :  { %v1460_v57 = vpop.f32.mrb[18].mxu0 }
0x19e3   :  { %v1464_v58 = vadd.f32 %v1460_v57, %v1155_v56  ;;  %v2470_v59 = vpop.f32.mrb[19].mxu0 }
0x19e5   :  { %2715 = vtanh.f32 %v1464_v58  ;;  %v1994_v58 = vld [vmem:[#allocation7 + $0x8] sm:$0xff] }
0x19e6   :  { %v2654_v59 = vpack.c.bf16 %v1994_v58, %v1993_v41 }
0x19ef   :  { %v2716_v60 = vpop.eup %2715 }
0x19f0   :  { %v1466_v61 = vmul.f32 %v2716_v60, %v2975_v31 }
0x19f2   :  { %v1467_v63 = vadd.f32 %v1466_v61, %v2977_v33 }
0x19f4   :  { %1470 = vrot.lane.b32.xlu0 %v1467_v63, %s2819_s3  ;;  %v1468_v1 = vmul.f32 %v1467_v63, %v1379_v48 }
0x1a66   :  { %v1471_v0 = vpop.permute.xlu0 %1470 }
0x1a67   :  { %v1473_v8 = vmul.f32 %v1471_v0, %v1467_v63  ;;  %v1995_v0 = vld [vmem:[#allocation7 + $0x10] sm:$0xff] }
0x1a69   :  { %1475 = vrot.lane.b32.xlu1 %v1473_v8, %s2820_s13  ;;  %v1996_v8 = vld [vmem:[#allocation7 + $0x18] sm:$0xff] }
0x1adb   :  { %v1476_v2 = vpop.permute.xlu1 %1475 }
0x1adc   :  { %v1478_v15 = vadd.f32 %v1476_v2, %v1468_v1  ;;  %v2658_v1 = vpack.c.bf16 %v1996_v8, %v1995_v0 }
0x1ade   :  { %2717 = vtanh.f32 %v1478_v15 }
0x1ae8   :  { %v2718_v39 = vpop.eup %2717 }
0x1ae9   :  { %1481 = vrot.lane.b32.xlu0 %v2718_v39, %s2819_s3  ;;  %v1986_v39 = vld [vmem:[#allocation3 + $0x8] sm:$0xff] }
0x1b5b   :  { %v1482_v3 = vpop.permute.xlu0 %1481 }
0x1b5c   :  { %v1484_v21 = vmul.f32 %v1482_v3, %v1467_v63 }
0x1b5e   :  { %1486 = vrot.lane.b32.xlu1 %v1484_v21, %s2820_s13 }
0x1bd0   :  { %v1487_v22 = vpop.permute.xlu1 %1486 }
0x1bd1   :  { %1489 = vst.msk [vmem:[#allocation3 + $0x10] sm:$0xff] %vm228_vm5, %v1487_v22  ;;  %2480 = vmatmul.mubr.msk.f32.vlgmr.msra.gmra.mrb[18].mxu1 %vm228_vm5, %v1487_v22 }
0x1bd2   :  { %2638 = vmatpush3.bf16.msra.mxu1 %v3118_v51  ;;  %2501 = vmatprep.mubr.msk.f32.mxu1 %vm2816_vm1, %v2817_v16 }
0x1bd3   :  { %2639 = vmatprep.subr.bf16.mxu1 %v2815_v10 }
0x1bd6   :  { %2641 = vmatpush3.bf16.msra.mxu1 %v3128_v54 }
0x1bd7   :  { %2648 = vmatprep.subr.bf16.mxu1 %v2815_v10 }
0x1bd8   :  { %v1987_v3 = vld [vmem:[#allocation3 + $0x10] sm:$0xff] }
0x1ca4   :  { %v1559_v17 = vpop.f32.mrb[18].mxu1 }
0x1ca5   :  { %v1563_v5 = vadd.f32 %v1559_v17, %v1160_v4  ;;  %v2481_v6 = vpop.f32.mrb[19].mxu1  ;;  %v1175_v17 = vadd.f32 %v3154_v62, %v3190_v50 }
0x1ca7   :  { %2719 = vtanh.f32 %v1563_v5 }
0x1cb1   :  { %v2720_v7 = vpop.eup %2719 }
0x1cb2   :  { %v1565_v9 = vmul.f32 %v2720_v7, %v2975_v31 }
0x1cb4   :  { %v1566_v11 = vadd.f32 %v1565_v9, %v2977_v33  ;;  %v3272_v9 = vld [vmem:[%s3325_s8] ss:$0 sm:$0xff]  ;;  %s2821_s8 = smov [#allocation9]  }
0x1cb5   :  { %s2146_s10 = sshll.u32 %s2821_s8, 4  ;;  %s2147_s10 = int_to_ptr.vmem [resolvable:$true] %s2146_s10 }
0x1cb6   :  { %1569 = vrot.lane.b32.xlu0 %v1566_v11, %s2819_s3  ;;  %v1567_v14 = vmul.f32 %v1566_v11, %v1478_v15  ;;  %v1985_v15 = vld [vmem:[#allocation3] sm:$0xff]  ;;  %p2788_p3 = scmp.lt.s32.totalorder %s2147_s10, %s2147_s10 }
0x1d28   :  { %v1570_v12 = vpop.permute.xlu0 %1569 }
0x1d29   :  { %v1572_v13 = vmul.f32 %v1570_v12, %v1566_v11 }
0x1d2b   :  { %1574 = vrot.lane.b32.xlu1 %v1572_v13, %s2820_s13 }
0x1d9d   :  { %v1575_v18 = vpop.permute.xlu1 %1574 }
0x1d9e   :  { %v1577_v20 = vadd.f32 %v1575_v18, %v1567_v14 }
0x1da0   :  { %2721 = vtanh.f32 %v1577_v20 }
0x1daa   :  { %v2722_v37 = vpop.eup %2721 }
0x1dab   :  { %1580 = vrot.lane.b32.xlu0 %v2722_v37, %s2819_s3 }
0x1e1d   :  { %v1581_v24 = vpop.permute.xlu0 %1580 }
0x1e1e   :  { %v1583_v25 = vmul.f32 %v1581_v24, %v1566_v11 }
0x1e20   :  { %1585 = vrot.lane.b32.xlu1 %v1583_v25, %s2820_s13 }
0x1e92   :  { %v1586_v26 = vpop.permute.xlu1 %1585 }
0x1e93   :  { %1588 = vst.msk [vmem:[#allocation3 + $0x18] sm:$0xff] %vm228_vm5, %v1586_v26  ;;  %2491 = vmatmul.mubr.msk.f32.vlgmr.msra.gmra.mrb[20].mxu0 %vm228_vm5, %v1586_v26 }
0x1e94   :  { %2644 = vmatpush3.bf16.msra.mxu0 %v3118_v51  ;;  %2512 = vmatprep.mubr.msk.f32.mxu0 %vm2816_vm1, %v2817_v16 }
0x1e95   :  { %2645 = vmatprep.subr.bf16.mxu0 %v2815_v10 }
0x1e98   :  { %2647 = vmatpush3.bf16.msra.mxu0 %v3128_v54 }
0x1e99   :  { %2655 = vmatprep.subr.bf16.mxu0 %v2654_v59 }
0x1e9a   :  { %v1988_v21 = vld [vmem:[#allocation3 + $0x18] sm:$0xff] }
0x1f66   :  { %v1658_v28 = vpop.f32.mrb[20].mxu0 }
0x1f67   :  { %v1662_v29 = vadd.f32 %v1658_v28, %v1165_v27  ;;  %v2492_v30 = vpop.f32.mrb[21].mxu0 }
0x1f69   :  { %2723 = vtanh.f32 %v1662_v29 }
0x1f73   :  { %v2724_v32 = vpop.eup %2723 }
0x1f74   :  { %v1664_v34 = vmul.f32 %v2724_v32, %v2975_v31 }
0x1f76   :  { %v1665_v36 = vadd.f32 %v1664_v34, %v2977_v33 }
0x1f78   :  { %1668 = vrot.lane.b32.xlu0 %v1665_v36, %s2819_s3  ;;  %v1666_v42 = vmul.f32 %v1665_v36, %v1577_v20 }
0x1fea   :  { %v1669_v38 = vpop.permute.xlu0 %1668 }
0x1feb   :  { %v1671_v40 = vmul.f32 %v1669_v38, %v1665_v36 }
0x1fed   :  { %1673 = vrot.lane.b32.xlu1 %v1671_v40, %s2820_s13 }
0x205f   :  { %v1674_v23 = vpop.permute.xlu1 %1673 }
0x2060   :  { %v1676_v44 = vadd.f32 %v1674_v23, %v1666_v42 }
0x2062   :  { %2725 = vtanh.f32 %v1676_v44 }
0x206c   :  { %v2726_v43 = vpop.eup %2725 }
0x206d   :  { %1679 = vrot.lane.b32.xlu0 %v2726_v43, %s2819_s3 }
0x20df   :  { %v1680_v35 = vpop.permute.xlu0 %1679 }
0x20e0   :  { %v1682_v45 = vmul.f32 %v1680_v35, %v1665_v36 }
0x20e2   :  { %1684 = vrot.lane.b32.xlu1 %v1682_v45, %s2820_s13  ;;  %v1180_v45 = vadd.f32 %v3188_v49, %v3154_v62 }
0x2154   :  { %v1685_v46 = vpop.permute.xlu1 %1684 }
0x2155   :  { %1687 = vst.msk [vmem:[#allocation3 + $0x20] sm:$0xff] %vm228_vm5, %v1685_v46  ;;  %2502 = vmatmul.mubr.msk.f32.vlgmr.msra.gmra.mrb[20].mxu1 %vm228_vm5, %v1685_v46 }
0x2156   :  { %2650 = vmatpush3.bf16.msra.mxu1 %v3118_v51  ;;  %2523 = vmatprep.mubr.msk.f32.mxu1 %vm2816_vm1, %v2817_v16 }
0x2157   :  { %2651 = vmatprep.subr.bf16.mxu1 %v2815_v10 }
0x215a   :  { %2653 = vmatpush3.bf16.msra.mxu1 %v3128_v54 }
0x215c   :  { %v1989_v22 = vld [vmem:[#allocation3 + $0x20] sm:$0xff] }
0x2228   :  { %v1757_v48 = vpop.f32.mrb[20].mxu1 }
0x2229   :  { %v1761_v52 = vadd.f32 %v1757_v48, %v1170_v47  ;;  %v2503_v53 = vpop.f32.mrb[21].mxu1 }
0x222b   :  { %2727 = vtanh.f32 %v1761_v52 }
0x2235   :  { %v2728_v55 = vpop.eup %2727 }
0x2236   :  { %v1763_v19 = vmul.f32 %v2728_v55, %v2975_v31 }
0x2238   :  { %v1764_v56 = vadd.f32 %v1763_v19, %v2977_v33 }
0x223a   :  { %1767 = vrot.lane.b32.xlu0 %v1764_v56, %s2819_s3  ;;  %v1765_v10 = vmul.f32 %v1764_v56, %v1676_v44 }
0x22ac   :  { %v1768_v51 = vpop.permute.xlu0 %1767 }
0x22ad   :  { %v1770_v16 = vmul.f32 %v1768_v51, %v1764_v56 }
0x22af   :  { %1772 = vrot.lane.b32.xlu1 %v1770_v16, %s2820_s13 }
0x2321   :  { %v1773_v54 = vpop.permute.xlu1 %1772 }
0x2322   :  { %v3254_v57 = vadd.f32 %v1773_v54, %v1765_v10 }
0x2324   :  { %2729 = vtanh.f32 %v3254_v57 }
0x232e   :  { %v2730_v60 = vpop.eup %2729 }
0x232f   :  { %1778 = vrot.lane.b32.xlu0 %v2730_v60, %s2819_s3 }
0x23a1   :  { %v1779_v61 = vpop.permute.xlu0 %1778 }
0x23a2   :  { %v1781_v63 = vmul.f32 %v1779_v61, %v1764_v56 }
0x23a4   :  { %1783 = vrot.lane.b32.xlu1 %v1781_v63, %s2820_s13 }
0x2416   :  { %v1784_v2 = vpop.permute.xlu1 %1783 }
0x2417   :  { %1786 = vst.msk [vmem:[#allocation3 + $0x28] sm:$0xff] %vm228_vm5, %v1784_v2  ;;  %2513 = vmatmul.mubr.msk.f32.vlgmr.msra.gmra.mrb[22].mxu0 %vm228_vm5, %v1784_v2 }
0x2418   :  { %2657 = vmatpush3.bf16.msra.mxu0 %v2654_v59  ;;  %2534 = vmatprep.mubr.msk.f32.mxu0 %vm228_vm5, %v1985_v15 }
0x2419   :  { %2659 = vmatprep.subr.bf16.mxu0 %v2658_v1 }
0x241c   :  { %2661 = vmatpush3.bf16.msra.mxu0 %v2658_v1 }
0x241e   :  { %v1990_v4 = vld [vmem:[#allocation3 + $0x28] sm:$0xff] }
0x241f   :  { %2535 = vmatmul.mubr.msk.f32.vlgmr.msra.gmra.mrb[24].mxu0 %vm228_vm5, %v1986_v39 }
0x2420   :  { %2537 = vmatprep.mubr.msk.f32.mxu0 %vm228_vm5, %v1987_v3 }
0x2423   :  { %2538 = vmatmul.mubr.msk.f32.gmra.mrb[26].mxu0 %vm228_vm5, %v1988_v21 }
0x2424   :  { %2540 = vmatprep.mubr.msk.f32.mxu0 %vm228_vm5, %v1989_v22 }
0x2427   :  { %2541 = vmatmul.mubr.msk.f32.gmra.mrb[28].mxu0 %vm228_vm5, %v1990_v4 }
0x24ea   :  { %v1856_v5 = vpop.f32.mrb[22].mxu0 }
0x24eb   :  { %v1860_v6 = vadd.f32 %v1856_v5, %v1175_v17  ;;  %v2514_v7 = vpop.f32.mrb[23].mxu0 }
0x24ed   :  { %2731 = vtanh.f32 %v1860_v6 }
0x24f2   :  { %v2536_v11 = vpop.f32.mrb[24].mxu0 }
0x24f3   :  { %v2100_v12 = vadd.f32 %v2536_v11, %v3272_v9  ;;  %v2094_v13 = vpop.f32.mrb[25].mxu0 }
0x24f4   :  { %v2095_v14 = vadd.f32 %v3272_v9, %v2094_v13 }
0x24f5   :  { %2134 = vst [vmem:[#allocation9 + $0x8] sm:$0xff] %v2100_v12 }
0x24f6   :  { %2133 = vst [vmem:[#allocation9] sm:$0xff] %v2095_v14  ;;  %v2539_v18 = vpop.f32.mrb[26].mxu0 }
0x24f7   :  { %v2732_v20 = vpop.eup %2731  ;;  %v2110_v50 = vadd.f32 %v2539_v18, %v3272_v9  ;;  %v2104_v37 = vpop.f32.mrb[27].mxu0 }
0x24f8   :  { %v2105_v24 = vadd.f32 %v3272_v9, %v2104_v37  ;;  %v1862_v25 = vmul.f32 %v2732_v20, %v2975_v31 }
0x24f9   :  { %2136 = vst [vmem:[#allocation9 + $0x18] sm:$0xff] %v2110_v50 }
0x24fa   :  { %2135 = vst [vmem:[#allocation9 + $0x10] sm:$0xff] %v2105_v24  ;;  %v2542_v26 = vpop.f32.mrb[28].mxu0  ;;  %v1863_v27 = vadd.f32 %v1862_v25, %v2977_v33 }
0x24fb   :  { %v2120_v28 = vadd.f32 %v2542_v26, %v3272_v9  ;;  %v2114_v29 = vpop.f32.mrb[29].mxu0 }
0x24fc   :  { %v2115_v30 = vadd.f32 %v3272_v9, %v2114_v29  ;;  %1866 = vrot.lane.b32.xlu0 %v1863_v27, %s2819_s3  ;;  %v1864_v36 = vmul.f32 %v1863_v27, %v3254_v57 }
0x24fd   :  { %2138 = vst [vmem:[#allocation9 + $0x28] sm:$0xff] %v2120_v28 }
0x24fe   :  { %2137 = vst [vmem:[#allocation9 + $0x20] sm:$0xff] %v2115_v30 }
0x256e   :  { %v1867_v32 = vpop.permute.xlu0 %1866 }
0x256f   :  { %v1869_v34 = vmul.f32 %v1867_v32, %v1863_v27 }
0x2571   :  { %1871 = vrot.lane.b32.xlu1 %v1869_v34, %s2820_s13 }
0x25e3   :  { %v1872_v38 = vpop.permute.xlu1 %1871 }
0x25e4   :  { %v1874_v40 = vadd.f32 %v1872_v38, %v1864_v36 }
0x25e6   :  { %2733 = vtanh.f32 %v1874_v40 }
0x25f0   :  { %v2734_v42 = vpop.eup %2733 }
0x25f1   :  { %1877 = vrot.lane.b32.xlu0 %v2734_v42, %s2819_s3 }
0x2663   :  { %v1878_v23 = vpop.permute.xlu0 %1877 }
0x2664   :  { %v1880_v44 = vmul.f32 %v1878_v23, %v1863_v27 }
0x2666   :  { %1882 = vrot.lane.b32.xlu1 %v1880_v44, %s2820_s13 }
0x26d8   :  { %v1883_v43 = vpop.permute.xlu1 %1882 }
0x26d9   :  { %1885 = vst.msk [vmem:[#allocation3 + $0x30] sm:$0xff] %vm228_vm5, %v1883_v43  ;;  %2524 = vmatmul.mubr.msk.f32.vlgmr.msra.gmra.mrb[22].mxu1 %vm228_vm5, %v1883_v43 }
0x26e0   :  { %v1991_v35 = vld [vmem:[#allocation3 + $0x30] sm:$0xff] }
0x26e1   :  { %2543 = vmatprep.mubr.msk.f32.mxu0 %vm228_vm5, %v1991_v35 }
0x27ac   :  { %v1955_v46 = vpop.f32.mrb[22].mxu1 }
0x27ad   :  { %v1959_v47 = vadd.f32 %v1955_v46, %v1180_v45  ;;  %v2525_v48 = vpop.f32.mrb[23].mxu1 }
0x27af   :  { %2735 = vtanh.f32 %v1959_v47 }
0x27b9   :  { %v2736_v52 = vpop.eup %2735 }
0x27ba   :  { %v1961_v53 = vmul.f32 %v2736_v52, %v2975_v31 }
0x27bc   :  { %v1962_v55 = vadd.f32 %v1961_v53, %v2977_v33 }
0x27be   :  { %1965 = vrot.lane.b32.xlu0 %v1962_v55, %s2819_s3  ;;  %v1963_v51 = vmul.f32 %v1962_v55, %v1874_v40 }
0x2830   :  { %v1966_v19 = vpop.permute.xlu0 %1965 }
0x2831   :  { %v1968_v56 = vmul.f32 %v1966_v19, %v1962_v55 }
0x2833   :  { %1970 = vrot.lane.b32.xlu1 %v1968_v56, %s2820_s13 }
0x28a5   :  { %v1971_v16 = vpop.permute.xlu1 %1970 }
0x28a6   :  { %v1973_v10 = vadd.f32 %v1971_v16, %v1963_v51 }
0x28a8   :  { %2737 = vtanh.f32 %v1973_v10 }
0x28b2   :  { %v2738_v62 = vpop.eup %2737 }
0x28b3   :  { %1976 = vrot.lane.b32.xlu0 %v2738_v62, %s2819_s3  ;;  %s2783_s3 = scalar_lea.vmem %s2147_s10, 1024 }
0x28b4   :  { %p2784_p2 = scmp.ne.s32.totalorder %s2147_s10, %s2783_s3  ;;  %p2789_p4 = scmp.lt.s32.totalorder %s2783_s3, %s2783_s3 }
0x28b6   :  { %p2790_p5 = por %p2789_p4, %p2788_p3 }
0x28b8   :  { %p2791_p6 = pnand %p2790_p5, %p2784_p2 }
0x2925   :  { %v1977_v49 = vpop.permute.xlu0 %1976 }
0x2926   :  { %v1979_v54 = vmul.f32 %v1977_v49, %v1962_v55 }
0x2928   :  { %1981 = vrot.lane.b32.xlu1 %v1979_v54, %s2820_s13 }
0x299a   :  { %v1982_v31 = vpop.permute.xlu1 %1981 }
0x299b   :  { %1984 = vst.msk [vmem:[#allocation3 + $0x38] sm:$0xff] %vm228_vm5, %v1982_v31 }
0x29a2   :  { %v1992_v33 = vld [vmem:[#allocation3 + $0x38] sm:$0xff] }
0x29a3   :  { %2544 = vmatmul.mubr.msk.f32.gmra.mrb[30].mxu0 %vm228_vm5, %v1992_v33 }
0x2a76   :  { %v2545_v57 = vpop.f32.mrb[30].mxu0 }
0x2a77   :  { %v2130_v41 = vadd.f32 %v2545_v57, %v3272_v9  ;;  %v2124_v58 = vpop.f32.mrb[31].mxu0 }
0x2a78   :  { %v2125_v59 = vadd.f32 %v3272_v9, %v2124_v58 }
0x2a79   :  { %2140 = vst [vmem:[#allocation9 + $0x38] sm:$0xff] %v2130_v41 }
0x2a7a   :  { %2139 = vst [vmem:[#allocation9 + $0x30] sm:$0xff] %v2125_v59 }
0x2a7b   :  { %2794 = shalt.err (!%p2791_p6)
}
0x2a7c   :  { %s2795_s15 = scalar_lea.hbm %s3326_s9, 1024 }
0x2a7d   :  { %p2796_p7 = scmp.ne.s32.totalorder %s3326_s9, %s2795_s15  ;;  %p2799_p8 = scmp.lt.u32.totalorder %s2795_s15, %s3326_s9 }
0x2a7f   :  { %p2801_p9 = pnand %p2799_p8, %p2796_p7 }
0x2a81   :  { %2804 = shalt.err (!%p2801_p9)
}
0x2a82   :  { %2152 = dma.vmem_to_hbm [thread:$0]  %s2147_s10, 1024, %s3326_s9, [#allocation6], %s2812_s19, %s2812_s19, %s2813_s20  }
0x2a83   :  { %2809 = dma.done.wait [#allocation6], 1024  }
0x2a84   :  { %2810 = vsyncadd [#allocation6], 4294966272 }
0x2a85   :  { %2156 = vsyncpa [#allocation5], 1 }
0x2a86   :  { %2157 = vsyncpa [#allocation8], 1 }
0x2a87   :  { %2158 = vsyncpa [#allocation6], 1 }

</bundles_post_ra>
